<compile_context>
chip_gen: v7x
topology: tpu7x:2x2x1
jax: 0.10.0
libtpu: 0.0.40
codegen_flags: <defaults>
</compile_context>

<pallas_src>
import functools

import jax
import jax.numpy as jnp
from jax.experimental import pallas as pl
from jax.experimental.pallas import tpu as pltpu

SELU_ALPHA = 1.6732632423543772
SELU_SCALE = 1.0507009873554805
_PAD_MAX = 4  # >= largest conv half-width (k=7 -> 3); 4 keeps bf16 sublane pairs aligned


def _selu(x):
    return SELU_SCALE * jnp.where(x > 0, x, SELU_ALPHA * (jnp.exp(x) - 1.0))


def _conv_block(xp_ref, x, w_ref, b_ref, K, TB, L, E, use_im2col):
    """Conv1d (stride 1, 'same' zero padding) + SELU over TB fused samples.

    x:      [TB, L, E] f32 (already masked)
    xp_ref: [TB, L + 2*_PAD_MAX, E] compute-dtype scratch, pad rows pre-zeroed
    w_ref:  [K*E, E]  (compute dtype), row index = k*E + e_in
    b_ref:  [1, E] f32
    """
    pad = (K - 1) // 2
    off = _PAD_MAX - pad
    cdtype = xp_ref.dtype
    # Cast to the compute dtype BEFORE any tap shuffling so the slab build / tap
    # reads move half the bytes on the bf16 path.
    xp_ref[:, _PAD_MAX:_PAD_MAX + L, :] = x.astype(cdtype)

    if use_im2col:
        # E % 128 == 0: the lane concat is pure vreg placement and the single
        # K*E-deep contraction gives the best MXU fill.
        slab = jnp.concatenate(
            [xp_ref[:, off + k: off + k + L, :] for k in range(K)], axis=-1)
        slab = slab.reshape(TB * L, K * E)
        y = jnp.dot(slab, w_ref[...], preferred_element_type=jnp.float32)
    else:
        # Tap accumulation: K depth-E matmuls accumulated in f32.  Avoids the
        # non-128-aligned lane concat (dominant cost when E % 128 != 0) and bounds
        # the VMEM temporaries to ~TB*L*E instead of ~K*TB*L*E.
        y = jnp.zeros((TB * L, E), jnp.float32)
        for k in range(K):
            tap = xp_ref[:, off + k: off + k + L, :].reshape(TB * L, E)
            y = y + jnp.dot(tap, w_ref[k * E:(k + 1) * E, :],
                            preferred_element_type=jnp.float32)

    y = y + b_ref[...]
    return _selu(y).reshape(TB, L, E)


def mix_pooling_kernel(seq_ref, mask_ref,
                       w1_ref, b1_ref, w2_ref, b2_ref, w3_ref, b3_ref,
                       gw_ref, gb_ref, out_ref, xp_ref, *, use_im2col):
    TB, L, E = seq_ref.shape

    seq = seq_ref[...].astype(jnp.float32)        # [TB, L, E]
    mask = mask_ref[...].astype(jnp.float32)      # [TB, L, 1]  (1.0 = valid)
    seq = seq * mask

    # --- global attention pooling (f32; VPU multiply + XLU lane reduce, no MXU) ---
    logits = jnp.sum(seq * gw_ref[...], axis=-1, keepdims=True) + gb_ref[0]
    logits = jnp.where(mask == 0.0, jnp.float32(-jnp.inf), logits)   # [TB, L, 1]
    m = jnp.max(logits, axis=1, keepdims=True)                       # [TB, 1, 1]
    p = jnp.exp(logits - m)
    p = p * pl.reciprocal(jnp.sum(p, axis=1, keepdims=True), approx=True)
    res = jnp.sum(p * seq, axis=1)                                   # [TB, E]

    # --- local aggregation: 3 masked Conv1d + SELU blocks (k = 3, 5, 7) ---
    # Pad rows are zeroed every grid step (must NOT be guarded by program_id==0:
    # that would break under megacore sharding of the parallel axis).
    zpad = jnp.zeros((TB, _PAD_MAX, E), xp_ref.dtype)
    xp_ref[:, :_PAD_MAX, :] = zpad
    xp_ref[:, _PAD_MAX + L:, :] = zpad

    x = _conv_block(xp_ref, seq, w1_ref, b1_ref, 3, TB, L, E, use_im2col) * mask
    x = _conv_block(xp_ref, x,   w2_ref, b2_ref, 5, TB, L, E, use_im2col) * mask
    x = _conv_block(xp_ref, x,   w3_ref, b3_ref, 7, TB, L, E, use_im2col) * mask

    mx = jnp.max(x, axis=1)                                          # [TB, E]

    out_ref[:, 0:1, :] = res[:, None, :]
    out_ref[:, 1:2, :] = mx[:, None, :]


def _flatten_conv_w(w, dtype):
    """torch Conv1d weight [E_out, E_in, K] -> fused-tap matrix [K*E_in, E_out]."""
    E_out, E_in, K = w.shape
    return jnp.transpose(w, (2, 1, 0)).reshape(K * E_in, E_out).astype(dtype)


def _tpu_vmem_bytes():
    try:
        return int(pltpu.get_tpu_info().vmem_capacity_bytes)
    except Exception:
        pass
    try:
        kind = jax.devices()[0].device_kind.lower()
        if "v7" in kind:
            return 64 << 20
    except Exception:
        pass
    return 128 << 20


def _mxu_rows():
    """LHS rows that fill the MXU M dimension on this generation."""
    try:
        kind = jax.devices()[0].device_kind.lower()
    except Exception:
        return 256
    for tag in ("v2", "v3", "v4", "v5"):
        if tag in kind:
            return 128          # 128-wide MXU
    return 256                  # v6e / v7x


def mix_pooling(seq, mask, params, *, tb=None, use_bf16=True):
    """seq: [B, L, E]; mask: [B, L] bool (True = padded). Returns [B, 2E] float32."""
    B, L, E = seq.shape
    w_dtype = jnp.bfloat16 if use_bf16 else jnp.float32
    cbytes = jnp.dtype(w_dtype).itemsize

    phys_vmem = _tpu_vmem_bytes()
    rows_target = _mxu_rows()

    if tb is None:
        # Fill the MXU M dimension (128 rows on v2-v5, 256 on v6e/v7x) ...
        tb = max(1, rows_target // max(L, 1))
        # ... but keep >= 2 grid steps so both v7x TensorCores get work.
        if B > 1:
            tb = min(tb, pl.cdiv(B, 2))
    TB = max(1, min(int(tb), B))
    n_blocks = pl.cdiv(B, TB)
    Bp = n_blocks * TB

    maskf = jnp.where(mask, 0.0, 1.0).astype(jnp.float32)[..., None]  # [B, L, 1]
    if Bp != B:
        pad_n = Bp - B
        seq = jnp.concatenate([seq, jnp.zeros((pad_n, L, E), seq.dtype)], axis=0)
        # Padding rows are marked fully valid so the masked softmax stays finite.
        maskf = jnp.concatenate(
            [maskf, jnp.ones((pad_n, L, 1), jnp.float32)], axis=0)

    w1 = _flatten_conv_w(params["w1"], w_dtype)   # [3E, E]
    w2 = _flatten_conv_w(params["w2"], w_dtype)   # [5E, E]
    w3 = _flatten_conv_w(params["w3"], w_dtype)   # [7E, E]
    b1 = params["b1"].reshape(1, E).astype(jnp.float32)
    b2 = params["b2"].reshape(1, E).astype(jnp.float32)
    b3 = params["b3"].reshape(1, E).astype(jnp.float32)
    gw = params["gw"].reshape(1, E).astype(jnp.float32)
    gb = params["gb"].reshape(1,).astype(jnp.float32)

    # Lane-aligned E and a modest slab -> im2col; otherwise K accumulated taps.
    slab_bytes = 7 * TB * L * E * cbytes
    use_im2col = (E % 128 == 0) and (slab_bytes <= (16 << 20))

    # VMEM budget: double-buffered I/O + persistent scratch + in-kernel temporaries
    # (im2col slab or single tap copy, f32 activations) + compiler headroom.
    w_bytes = (3 + 5 + 7) * E * E * cbytes + 4 * E * 4 + 4
    io_bytes = 2 * (w_bytes
                    + TB * L * E * jnp.dtype(seq.dtype).itemsize   # seq tile
                    + TB * L * 4                                    # mask tile
                    + TB * 2 * E * 4)                               # output tile
    scratch_bytes = TB * (L + 2 * _PAD_MAX) * E * cbytes
    tmp_bytes = (slab_bytes if use_im2col else TB * L * E * cbytes) \
        + 4 * TB * L * E * 4
    need = io_bytes + scratch_bytes + tmp_bytes + (16 << 20)
    cap = max(min(phys_vmem - (8 << 20), 100 << 20), 32 << 20)
    vmem_limit = int(min(max(need, 32 << 20), cap))

    full2 = lambda shape: pl.BlockSpec(shape, lambda b: (0, 0))

    kernel = functools.partial(mix_pooling_kernel, use_im2col=use_im2col)

    out = pl.pallas_call(
        kernel,
        out_shape=jax.ShapeDtypeStruct((Bp, 2, E), jnp.float32),
        grid=(n_blocks,),
        in_specs=[
            pl.BlockSpec((TB, L, E), lambda b: (b, 0, 0)),      # seq tile
            pl.BlockSpec((TB, L, 1), lambda b: (b, 0, 0)),      # mask tile (float)
            full2((3 * E, E)), full2((1, E)),                   # conv1 w, b
            full2((5 * E, E)), full2((1, E)),                   # conv2 w, b
            full2((7 * E, E)), full2((1, E)),                   # conv3 w, b
            full2((1, E)),                                      # global linear w row
            pl.BlockSpec(memory_space=pltpu.MemorySpace.SMEM),  # global bias scalar
        ],
        out_specs=pl.BlockSpec((TB, 2, E), lambda b: (b, 0, 0)),
        scratch_shapes=[pltpu.VMEM((TB, L + 2 * _PAD_MAX, E), w_dtype)],
        compiler_params=pltpu.CompilerParams(
            dimension_semantics=("parallel",),
            vmem_limit_bytes=vmem_limit),
    )(seq, maskf, w1, b1, w2, b2, w3, b3, gw, gb)

    return out.reshape(Bp, 2 * E)[:B]


# ----------------------- pure-JAX reference (for checking) -----------------------
def mix_pooling_ref(seq, mask, params):
    maskf = jnp.where(mask, 0.0, 1.0).astype(jnp.float32)[..., None]
    s = seq * maskf
    logits = s @ params["gw"] + params["gb"]
    logits = jnp.where(maskf == 0.0, -jnp.inf, logits)
    pw = jax.nn.softmax(logits, axis=1)
    res = jnp.sum(pw * s, axis=1)

    def conv_block(x_ble, w, b, pad):
        x_ncl = jnp.transpose(x_ble, (0, 2, 1))
        y = jax.lax.conv_general_dilated(
            x_ncl, w, window_strides=(1,), padding=[(pad, pad)],
            dimension_numbers=("NCW", "OIW", "NCW"))
        y = y + b[None, :, None]
        y = jax.nn.selu(y)
        return jnp.transpose(y, (0, 2, 1))

    x = conv_block(s, params["w1"], params["b1"], 1) * maskf
    x = conv_block(x, params["w2"], params["b2"], 2) * maskf
    x = conv_block(x, params["w3"], params["b3"], 3) * maskf
    mx = jnp.max(x, axis=1)
    return jnp.concatenate([res, mx], axis=1)


def make_params(E, key):
    ks = jax.random.split(key, 8)

    def conv_w(k, K):
        return (jax.random.normal(k, (E, E, K), jnp.float32)
                * (1.0 / jnp.sqrt(E * K)))

    return {
        "w1": conv_w(ks[0], 3),
        "b1": 0.01 * jax.random.normal(ks[1], (E,), jnp.float32),
        "w2": conv_w(ks[2], 5),
        "b2": 0.01 * jax.random.normal(ks[3], (E,), jnp.float32),
        "w3": conv_w(ks[4], 7),
        "b3": 0.01 * jax.random.normal(ks[5], (E,), jnp.float32),
        "gw": jax.random.normal(ks[6], (E, 1), jnp.float32) / jnp.sqrt(E),
        "gb": 0.01 * jax.random.normal(ks[7], (1,), jnp.float32),
    }


if __name__ == "__main__":
    key = jax.random.PRNGKey(0)

    # ---- case 1: E not a multiple of 128 -> tap-accumulation conv path ----
    B, L, E = 5, 16, 32
    kseq, kparam, kseq2, kparam2 = jax.random.split(key, 4)

    seq = jax.random.normal(kseq, (B, L, E), jnp.float32)
    valid_len = jnp.array([12, 9, 16, 5, 7])
    mask = jnp.arange(L)[None, :] >= valid_len[:, None]   # True = padded (as in torch)

    params = make_params(E, kparam)
    ref = mix_pooling_ref(seq, mask, params)

    # f32 path with a small batch tile: exercises multi-step grid + batch padding.
    out = jax.block_until_ready(mix_pooling(seq, mask, params, tb=2, use_bf16=False))
    assert out.shape == (B, 2 * E)
    assert jnp.allclose(out, ref, atol=5e-3, rtol=5e-3), (
        f"f32 max abs diff = {jnp.max(jnp.abs(out - ref))}")

    # default path (bf16 MXU, generation-aware tile heuristic).
    out_bf16 = jax.block_until_ready(mix_pooling(seq, mask, params))
    assert out_bf16.shape == (B, 2 * E)
    assert jnp.allclose(out_bf16, ref, atol=1e-1, rtol=1e-1), (
        f"bf16 max abs diff = {jnp.max(jnp.abs(out_bf16 - ref))}")

    # ---- case 2: E multiple of 128 -> lane-aligned im2col conv path ----
    B2, L2, E2 = 4, 8, 128
    seq2 = jax.random.normal(kseq2, (B2, L2, E2), jnp.float32)
    valid_len2 = jnp.array([8, 3, 6, 5])
    mask2 = jnp.arange(L2)[None, :] >= valid_len2[:, None]
    params2 = make_params(E2, kparam2)
    ref2 = mix_pooling_ref(seq2, mask2, params2)

    out2 = jax.block_until_ready(mix_pooling(seq2, mask2, params2))
    assert out2.shape == (B2, 2 * E2)
    assert jnp.allclose(out2, ref2, atol=1e-1, rtol=1e-1), (
        f"bf16 im2col max abs diff = {jnp.max(jnp.abs(out2 - ref2))}")

    print("KERNEL_OK")
</pallas_src>

<mosaic_0001>
module attributes {stable_mosaic.version = 11 : i64} {
  func.func @mix_pooling_kernel(%arg0: i32, %arg1: memref<2x16x32xf32, #tpu.memory_space<vmem>>, %arg2: memref<2x16x1xf32, #tpu.memory_space<vmem>>, %arg3: memref<96x32xf32, #tpu.memory_space<vmem>>, %arg4: memref<1x32xf32, #tpu.memory_space<vmem>>, %arg5: memref<160x32xf32, #tpu.memory_space<vmem>>, %arg6: memref<1x32xf32, #tpu.memory_space<vmem>>, %arg7: memref<224x32xf32, #tpu.memory_space<vmem>>, %arg8: memref<1x32xf32, #tpu.memory_space<vmem>>, %arg9: memref<1x32xf32, #tpu.memory_space<vmem>>, %arg10: memref<1xf32, #tpu.memory_space<smem>>, %arg11: memref<2x2x32xf32, #tpu.memory_space<vmem>>, %arg12: memref<2x24x32xf32, #tpu.memory_space<vmem>>) attributes {dimension_semantics = [#tpu.dimension_semantics<parallel>], iteration_bounds = array<i64: 3>, scalar_prefetch = 0 : i64, scratch_operands = 1 : i64, tpu.core_type = #tpu.core_type<tc>, window_params = [{transform_indices = @transform_0, window_bounds = array<i64: 2, 16, 32>}, {transform_indices = @transform_1, window_bounds = array<i64: 2, 16, 1>}, {pipeline_mode = #tpu.pipeline_mode<synchronous>, transform_indices = @transform_2, window_bounds = array<i64: 96, 32>}, {pipeline_mode = #tpu.pipeline_mode<synchronous>, transform_indices = @transform_3, window_bounds = array<i64: 1, 32>}, {pipeline_mode = #tpu.pipeline_mode<synchronous>, transform_indices = @transform_4, window_bounds = array<i64: 160, 32>}, {pipeline_mode = #tpu.pipeline_mode<synchronous>, transform_indices = @transform_5, window_bounds = array<i64: 1, 32>}, {pipeline_mode = #tpu.pipeline_mode<synchronous>, transform_indices = @transform_6, window_bounds = array<i64: 224, 32>}, {pipeline_mode = #tpu.pipeline_mode<synchronous>, transform_indices = @transform_7, window_bounds = array<i64: 1, 32>}, {pipeline_mode = #tpu.pipeline_mode<synchronous>, transform_indices = @transform_8, window_bounds = array<i64: 1, 32>}, {transform_indices = @transform_9, window_bounds = array<i64: 1>}, {transform_indices = @transform_10, window_bounds = array<i64: 2, 2, 32>}]} {
    %c0 = arith.constant 0 : index
    %c0_0 = arith.constant 0 : index
    %c0_1 = arith.constant 0 : index
    %0 = vector.load %arg1[%c0, %c0_0, %c0_1] : memref<2x16x32xf32, #tpu.memory_space<vmem>>, vector<2x16x32xf32>
    %c0_2 = arith.constant 0 : index
    %c0_3 = arith.constant 0 : index
    %c0_4 = arith.constant 0 : index
    %1 = vector.load %arg2[%c0_2, %c0_3, %c0_4] : memref<2x16x1xf32, #tpu.memory_space<vmem>>, vector<2x16x1xf32>
    %2 = vector.broadcast %1 : vector<2x16x1xf32> to vector<2x16x32xf32>
    %3 = arith.mulf %0, %2 : vector<2x16x32xf32>
    %c0_5 = arith.constant 0 : index
    %c0_6 = arith.constant 0 : index
    %4 = vector.load %arg9[%c0_5, %c0_6] : memref<1x32xf32, #tpu.memory_space<vmem>>, vector<1x32xf32>
    %5 = vector.shape_cast %4 : vector<1x32xf32> to vector<1x1x32xf32>
    %6 = vector.broadcast %5 : vector<1x1x32xf32> to vector<2x16x32xf32>
    %7 = arith.mulf %3, %6 : vector<2x16x32xf32>
    %cst = arith.constant dense<0.000000e+00> : vector<2x16xf32>
    %8 = vector.multi_reduction <add>, %7, %cst [2] : vector<2x16x32xf32> to vector<2x16xf32>
    %9 = vector.shape_cast %8 : vector<2x16xf32> to vector<2x16x1xf32>
    %c0_7 = arith.constant 0 : index
    %10 = memref.load %arg10[%c0_7] : memref<1xf32, #tpu.memory_space<smem>>
    %11 = vector.broadcast %10 : f32 to vector<2x16x1xf32>
    %12 = arith.addf %9, %11 : vector<2x16x1xf32>
    %cst_8 = arith.constant 0.000000e+00 : f32
    %13 = vector.broadcast %cst_8 : f32 to vector<2x16x1xf32>
    %14 = arith.cmpf oeq, %1, %13 : vector<2x16x1xf32>
    %cst_9 = arith.constant 0xFF800000 : f32
    %15 = vector.broadcast %cst_9 : f32 to vector<2x16x1xf32>
    %16 = arith.select %14, %15, %12 : vector<2x16x1xi1>, vector<2x16x1xf32>
    %cst_10 = arith.constant dense<0xFF800000> : vector<2x1xf32>
    %17 = vector.multi_reduction <maximumf>, %16, %cst_10 [1] : vector<2x16x1xf32> to vector<2x1xf32>
    %18 = vector.shape_cast %17 : vector<2x1xf32> to vector<2x1x1xf32>
    %19 = vector.broadcast %18 : vector<2x1x1xf32> to vector<2x16x1xf32>
    %20 = arith.subf %16, %19 : vector<2x16x1xf32>
    %21 = math.exp %20 : vector<2x16x1xf32>
    %cst_11 = arith.constant dense<0.000000e+00> : vector<2x1xf32>
    %22 = vector.multi_reduction <add>, %21, %cst_11 [1] : vector<2x16x1xf32> to vector<2x1xf32>
    %23 = vector.shape_cast %22 : vector<2x1xf32> to vector<2x1x1xf32>
    %24 = tpu.reciprocal %23 {approx = true} : vector<2x1x1xf32> -> vector<2x1x1xf32>
    %25 = vector.broadcast %24 : vector<2x1x1xf32> to vector<2x16x1xf32>
    %26 = arith.mulf %21, %25 : vector<2x16x1xf32>
    %27 = vector.broadcast %26 : vector<2x16x1xf32> to vector<2x16x32xf32>
    %28 = arith.mulf %27, %3 : vector<2x16x32xf32>
    %cst_12 = arith.constant dense<0.000000e+00> : vector<2x32xf32>
    %29 = vector.multi_reduction <add>, %28, %cst_12 [1] : vector<2x16x32xf32> to vector<2x32xf32>
    %cst_13 = arith.constant 0.000000e+00 : f32
    %30 = vector.broadcast %cst_13 : f32 to vector<2x4x32xf32>
    %c0_14 = arith.constant 0 : index
    %c0_15 = arith.constant 0 : index
    %c0_16 = arith.constant 0 : index
    %31 = vector.load %arg12[%c0_14, %c0_15, %c0_16] : memref<2x24x32xf32, #tpu.memory_space<vmem>>, vector<2x4x32xf32>
    tpu.vector_store %arg12[%c0_14, %c0_15, %c0_16], %30 {strides = array<i32>} : memref<2x24x32xf32, #tpu.memory_space<vmem>>, vector<2x4x32xf32>,
    %c0_17 = arith.constant 0 : index
    %c20 = arith.constant 20 : index
    %c0_18 = arith.constant 0 : index
    %32 = vector.load %arg12[%c0_17, %c20, %c0_18] : memref<2x24x32xf32, #tpu.memory_space<vmem>>, vector<2x4x32xf32>
    tpu.vector_store %arg12[%c0_17, %c20, %c0_18], %30 {strides = array<i32>} : memref<2x24x32xf32, #tpu.memory_space<vmem>>, vector<2x4x32xf32>,
    %c0_19 = arith.constant 0 : index
    %c4 = arith.constant 4 : index
    %c0_20 = arith.constant 0 : index
    %33 = vector.load %arg12[%c0_19, %c4, %c0_20] : memref<2x24x32xf32, #tpu.memory_space<vmem>>, vector<2x16x32xf32>
    tpu.vector_store %arg12[%c0_19, %c4, %c0_20], %3 {strides = array<i32>} : memref<2x24x32xf32, #tpu.memory_space<vmem>>, vector<2x16x32xf32>,
    %cst_21 = arith.constant 0.000000e+00 : f32
    %34 = vector.broadcast %cst_21 : f32 to vector<32x32xf32>
    %c0_22 = arith.constant 0 : index
    %c3 = arith.constant 3 : index
    %c0_23 = arith.constant 0 : index
    %35 = vector.load %arg12[%c0_22, %c3, %c0_23] : memref<2x24x32xf32, #tpu.memory_space<vmem>>, vector<2x16x32xf32>
    %36 = vector.shape_cast %35 : vector<2x16x32xf32> to vector<32x32xf32>
    %c0_24 = arith.constant 0 : index
    %c0_25 = arith.constant 0 : index
    %37 = vector.load %arg3[%c0_24, %c0_25] : memref<96x32xf32, #tpu.memory_space<vmem>>, vector<32x32xf32>
    %cst_26 = arith.constant dense<0.000000e+00> : vector<32x32xf32>
    %38 = tpu.matmul %36, %37, %cst_26 {dimension_numbers = #tpu.dot_dimension_numbers<[1], [0], [0], [1], [0, 0, 1, 1], [], []>} : vector<32x32xf32>, vector<32x32xf32>, vector<32x32xf32> -> vector<32x32xf32>
    %39 = arith.addf %34, %38 : vector<32x32xf32>
    %c0_27 = arith.constant 0 : index
    %c4_28 = arith.constant 4 : index
    %c0_29 = arith.constant 0 : index
    %40 = vector.load %arg12[%c0_27, %c4_28, %c0_29] : memref<2x24x32xf32, #tpu.memory_space<vmem>>, vector<2x16x32xf32>
    %41 = vector.shape_cast %40 : vector<2x16x32xf32> to vector<32x32xf32>
    %c32 = arith.constant 32 : index
    %c0_30 = arith.constant 0 : index
    %42 = vector.load %arg3[%c32, %c0_30] : memref<96x32xf32, #tpu.memory_space<vmem>>, vector<32x32xf32>
    %cst_31 = arith.constant dense<0.000000e+00> : vector<32x32xf32>
    %43 = tpu.matmul %41, %42, %cst_31 {dimension_numbers = #tpu.dot_dimension_numbers<[1], [0], [0], [1], [0, 0, 1, 1], [], []>} : vector<32x32xf32>, vector<32x32xf32>, vector<32x32xf32> -> vector<32x32xf32>
    %44 = arith.addf %39, %43 : vector<32x32xf32>
    %c0_32 = arith.constant 0 : index
    %c5 = arith.constant 5 : index
    %c0_33 = arith.constant 0 : index
    %45 = vector.load %arg12[%c0_32, %c5, %c0_33] : memref<2x24x32xf32, #tpu.memory_space<vmem>>, vector<2x16x32xf32>
    %46 = vector.shape_cast %45 : vector<2x16x32xf32> to vector<32x32xf32>
    %c64 = arith.constant 64 : index
    %c0_34 = arith.constant 0 : index
    %47 = vector.load %arg3[%c64, %c0_34] : memref<96x32xf32, #tpu.memory_space<vmem>>, vector<32x32xf32>
    %cst_35 = arith.constant dense<0.000000e+00> : vector<32x32xf32>
    %48 = tpu.matmul %46, %47, %cst_35 {dimension_numbers = #tpu.dot_dimension_numbers<[1], [0], [0], [1], [0, 0, 1, 1], [], []>} : vector<32x32xf32>, vector<32x32xf32>, vector<32x32xf32> -> vector<32x32xf32>
    %49 = arith.addf %44, %48 : vector<32x32xf32>
    %c0_36 = arith.constant 0 : index
    %c0_37 = arith.constant 0 : index
    %50 = vector.load %arg4[%c0_36, %c0_37] : memref<1x32xf32, #tpu.memory_space<vmem>>, vector<1x32xf32>
    %51 = vector.broadcast %50 : vector<1x32xf32> to vector<32x32xf32>
    %52 = arith.addf %49, %51 : vector<32x32xf32>
    %cst_38 = arith.constant 0.000000e+00 : f32
    %53 = vector.broadcast %cst_38 : f32 to vector<32x32xf32>
    %54 = arith.cmpf ogt, %52, %53 : vector<32x32xf32>
    %55 = math.exp %52 : vector<32x32xf32>
    %cst_39 = arith.constant 1.000000e+00 : f32
    %56 = vector.broadcast %cst_39 : f32 to vector<32x32xf32>
    %57 = arith.subf %55, %56 : vector<32x32xf32>
    %cst_40 = arith.constant 1.67326319 : f32
    %58 = vector.broadcast %cst_40 : f32 to vector<32x32xf32>
    %59 = arith.mulf %58, %57 : vector<32x32xf32>
    %60 = arith.select %54, %52, %59 : vector<32x32xi1>, vector<32x32xf32>
    %cst_41 = arith.constant 1.05070102 : f32
    %61 = vector.broadcast %cst_41 : f32 to vector<32x32xf32>
    %62 = arith.mulf %61, %60 : vector<32x32xf32>
    %63 = vector.shape_cast %62 : vector<32x32xf32> to vector<2x16x32xf32>
    %64 = vector.broadcast %1 : vector<2x16x1xf32> to vector<2x16x32xf32>
    %65 = arith.mulf %63, %64 : vector<2x16x32xf32>
    %c0_42 = arith.constant 0 : index
    %c4_43 = arith.constant 4 : index
    %c0_44 = arith.constant 0 : index
    %66 = vector.load %arg12[%c0_42, %c4_43, %c0_44] : memref<2x24x32xf32, #tpu.memory_space<vmem>>, vector<2x16x32xf32>
    tpu.vector_store %arg12[%c0_42, %c4_43, %c0_44], %65 {strides = array<i32>} : memref<2x24x32xf32, #tpu.memory_space<vmem>>, vector<2x16x32xf32>,
    %cst_45 = arith.constant 0.000000e+00 : f32
    %67 = vector.broadcast %cst_45 : f32 to vector<32x32xf32>
    %c0_46 = arith.constant 0 : index
    %c2 = arith.constant 2 : index
    %c0_47 = arith.constant 0 : index
    %68 = vector.load %arg12[%c0_46, %c2, %c0_47] : memref<2x24x32xf32, #tpu.memory_space<vmem>>, vector<2x16x32xf32>
    %69 = vector.shape_cast %68 : vector<2x16x32xf32> to vector<32x32xf32>
    %c0_48 = arith.constant 0 : index
    %c0_49 = arith.constant 0 : index
    %70 = vector.load %arg5[%c0_48, %c0_49] : memref<160x32xf32, #tpu.memory_space<vmem>>, vector<32x32xf32>
    %cst_50 = arith.constant dense<0.000000e+00> : vector<32x32xf32>
    %71 = tpu.matmul %69, %70, %cst_50 {dimension_numbers = #tpu.dot_dimension_numbers<[1], [0], [0], [1], [0, 0, 1, 1], [], []>} : vector<32x32xf32>, vector<32x32xf32>, vector<32x32xf32> -> vector<32x32xf32>
    %72 = arith.addf %67, %71 : vector<32x32xf32>
    %c0_51 = arith.constant 0 : index
    %c3_52 = arith.constant 3 : index
    %c0_53 = arith.constant 0 : index
    %73 = vector.load %arg12[%c0_51, %c3_52, %c0_53] : memref<2x24x32xf32, #tpu.memory_space<vmem>>, vector<2x16x32xf32>
    %74 = vector.shape_cast %73 : vector<2x16x32xf32> to vector<32x32xf32>
    %c32_54 = arith.constant 32 : index
    %c0_55 = arith.constant 0 : index
    %75 = vector.load %arg5[%c32_54, %c0_55] : memref<160x32xf32, #tpu.memory_space<vmem>>, vector<32x32xf32>
    %cst_56 = arith.constant dense<0.000000e+00> : vector<32x32xf32>
    %76 = tpu.matmul %74, %75, %cst_56 {dimension_numbers = #tpu.dot_dimension_numbers<[1], [0], [0], [1], [0, 0, 1, 1], [], []>} : vector<32x32xf32>, vector<32x32xf32>, vector<32x32xf32> -> vector<32x32xf32>
    %77 = arith.addf %72, %76 : vector<32x32xf32>
    %c0_57 = arith.constant 0 : index
    %c4_58 = arith.constant 4 : index
    %c0_59 = arith.constant 0 : index
    %78 = vector.load %arg12[%c0_57, %c4_58, %c0_59] : memref<2x24x32xf32, #tpu.memory_space<vmem>>, vector<2x16x32xf32>
    %79 = vector.shape_cast %78 : vector<2x16x32xf32> to vector<32x32xf32>
    %c64_60 = arith.constant 64 : index
    %c0_61 = arith.constant 0 : index
    %80 = vector.load %arg5[%c64_60, %c0_61] : memref<160x32xf32, #tpu.memory_space<vmem>>, vector<32x32xf32>
    %cst_62 = arith.constant dense<0.000000e+00> : vector<32x32xf32>
    %81 = tpu.matmul %79, %80, %cst_62 {dimension_numbers = #tpu.dot_dimension_numbers<[1], [0], [0], [1], [0, 0, 1, 1], [], []>} : vector<32x32xf32>, vector<32x32xf32>, vector<32x32xf32> -> vector<32x32xf32>
    %82 = arith.addf %77, %81 : vector<32x32xf32>
    %c0_63 = arith.constant 0 : index
    %c5_64 = arith.constant 5 : index
    %c0_65 = arith.constant 0 : index
    %83 = vector.load %arg12[%c0_63, %c5_64, %c0_65] : memref<2x24x32xf32, #tpu.memory_space<vmem>>, vector<2x16x32xf32>
    %84 = vector.shape_cast %83 : vector<2x16x32xf32> to vector<32x32xf32>
    %c96 = arith.constant 96 : index
    %c0_66 = arith.constant 0 : index
    %85 = vector.load %arg5[%c96, %c0_66] : memref<160x32xf32, #tpu.memory_space<vmem>>, vector<32x32xf32>
    %cst_67 = arith.constant dense<0.000000e+00> : vector<32x32xf32>
    %86 = tpu.matmul %84, %85, %cst_67 {dimension_numbers = #tpu.dot_dimension_numbers<[1], [0], [0], [1], [0, 0, 1, 1], [], []>} : vector<32x32xf32>, vector<32x32xf32>, vector<32x32xf32> -> vector<32x32xf32>
    %87 = arith.addf %82, %86 : vector<32x32xf32>
    %c0_68 = arith.constant 0 : index
    %c6 = arith.constant 6 : index
    %c0_69 = arith.constant 0 : index
    %88 = vector.load %arg12[%c0_68, %c6, %c0_69] : memref<2x24x32xf32, #tpu.memory_space<vmem>>, vector<2x16x32xf32>
    %89 = vector.shape_cast %88 : vector<2x16x32xf32> to vector<32x32xf32>
    %c128 = arith.constant 128 : index
    %c0_70 = arith.constant 0 : index
    %90 = vector.load %arg5[%c128, %c0_70] : memref<160x32xf32, #tpu.memory_space<vmem>>, vector<32x32xf32>
    %cst_71 = arith.constant dense<0.000000e+00> : vector<32x32xf32>
    %91 = tpu.matmul %89, %90, %cst_71 {dimension_numbers = #tpu.dot_dimension_numbers<[1], [0], [0], [1], [0, 0, 1, 1], [], []>} : vector<32x32xf32>, vector<32x32xf32>, vector<32x32xf32> -> vector<32x32xf32>
    %92 = arith.addf %87, %91 : vector<32x32xf32>
    %c0_72 = arith.constant 0 : index
    %c0_73 = arith.constant 0 : index
    %93 = vector.load %arg6[%c0_72, %c0_73] : memref<1x32xf32, #tpu.memory_space<vmem>>, vector<1x32xf32>
    %94 = vector.broadcast %93 : vector<1x32xf32> to vector<32x32xf32>
    %95 = arith.addf %92, %94 : vector<32x32xf32>
    %cst_74 = arith.constant 0.000000e+00 : f32
    %96 = vector.broadcast %cst_74 : f32 to vector<32x32xf32>
    %97 = arith.cmpf ogt, %95, %96 : vector<32x32xf32>
    %98 = math.exp %95 : vector<32x32xf32>
    %cst_75 = arith.constant 1.000000e+00 : f32
    %99 = vector.broadcast %cst_75 : f32 to vector<32x32xf32>
    %100 = arith.subf %98, %99 : vector<32x32xf32>
    %cst_76 = arith.constant 1.67326319 : f32
    %101 = vector.broadcast %cst_76 : f32 to vector<32x32xf32>
    %102 = arith.mulf %101, %100 : vector<32x32xf32>
    %103 = arith.select %97, %95, %102 : vector<32x32xi1>, vector<32x32xf32>
    %cst_77 = arith.constant 1.05070102 : f32
    %104 = vector.broadcast %cst_77 : f32 to vector<32x32xf32>
    %105 = arith.mulf %104, %103 : vector<32x32xf32>
    %106 = vector.shape_cast %105 : vector<32x32xf32> to vector<2x16x32xf32>
    %107 = vector.broadcast %1 : vector<2x16x1xf32> to vector<2x16x32xf32>
    %108 = arith.mulf %106, %107 : vector<2x16x32xf32>
    %c0_78 = arith.constant 0 : index
    %c4_79 = arith.constant 4 : index
    %c0_80 = arith.constant 0 : index
    %109 = vector.load %arg12[%c0_78, %c4_79, %c0_80] : memref<2x24x32xf32, #tpu.memory_space<vmem>>, vector<2x16x32xf32>
    tpu.vector_store %arg12[%c0_78, %c4_79, %c0_80], %108 {strides = array<i32>} : memref<2x24x32xf32, #tpu.memory_space<vmem>>, vector<2x16x32xf32>,
    %cst_81 = arith.constant 0.000000e+00 : f32
    %110 = vector.broadcast %cst_81 : f32 to vector<32x32xf32>
    %c0_82 = arith.constant 0 : index
    %c1 = arith.constant 1 : index
    %c0_83 = arith.constant 0 : index
    %111 = vector.load %arg12[%c0_82, %c1, %c0_83] : memref<2x24x32xf32, #tpu.memory_space<vmem>>, vector<2x16x32xf32>
    %112 = vector.shape_cast %111 : vector<2x16x32xf32> to vector<32x32xf32>
    %c0_84 = arith.constant 0 : index
    %c0_85 = arith.constant 0 : index
    %113 = vector.load %arg7[%c0_84, %c0_85] : memref<224x32xf32, #tpu.memory_space<vmem>>, vector<32x32xf32>
    %cst_86 = arith.constant dense<0.000000e+00> : vector<32x32xf32>
    %114 = tpu.matmul %112, %113, %cst_86 {dimension_numbers = #tpu.dot_dimension_numbers<[1], [0], [0], [1], [0, 0, 1, 1], [], []>} : vector<32x32xf32>, vector<32x32xf32>, vector<32x32xf32> -> vector<32x32xf32>
    %115 = arith.addf %110, %114 : vector<32x32xf32>
    %c0_87 = arith.constant 0 : index
    %c2_88 = arith.constant 2 : index
    %c0_89 = arith.constant 0 : index
    %116 = vector.load %arg12[%c0_87, %c2_88, %c0_89] : memref<2x24x32xf32, #tpu.memory_space<vmem>>, vector<2x16x32xf32>
    %117 = vector.shape_cast %116 : vector<2x16x32xf32> to vector<32x32xf32>
    %c32_90 = arith.constant 32 : index
    %c0_91 = arith.constant 0 : index
    %118 = vector.load %arg7[%c32_90, %c0_91] : memref<224x32xf32, #tpu.memory_space<vmem>>, vector<32x32xf32>
    %cst_92 = arith.constant dense<0.000000e+00> : vector<32x32xf32>
    %119 = tpu.matmul %117, %118, %cst_92 {dimension_numbers = #tpu.dot_dimension_numbers<[1], [0], [0], [1], [0, 0, 1, 1], [], []>} : vector<32x32xf32>, vector<32x32xf32>, vector<32x32xf32> -> vector<32x32xf32>
    %120 = arith.addf %115, %119 : vector<32x32xf32>
    %c0_93 = arith.constant 0 : index
    %c3_94 = arith.constant 3 : index
    %c0_95 = arith.constant 0 : index
    %121 = vector.load %arg12[%c0_93, %c3_94, %c0_95] : memref<2x24x32xf32, #tpu.memory_space<vmem>>, vector<2x16x32xf32>
    %122 = vector.shape_cast %121 : vector<2x16x32xf32> to vector<32x32xf32>
    %c64_96 = arith.constant 64 : index
    %c0_97 = arith.constant 0 : index
    %123 = vector.load %arg7[%c64_96, %c0_97] : memref<224x32xf32, #tpu.memory_space<vmem>>, vector<32x32xf32>
    %cst_98 = arith.constant dense<0.000000e+00> : vector<32x32xf32>
    %124 = tpu.matmul %122, %123, %cst_98 {dimension_numbers = #tpu.dot_dimension_numbers<[1], [0], [0], [1], [0, 0, 1, 1], [], []>} : vector<32x32xf32>, vector<32x32xf32>, vector<32x32xf32> -> vector<32x32xf32>
    %125 = arith.addf %120, %124 : vector<32x32xf32>
    %c0_99 = arith.constant 0 : index
    %c4_100 = arith.constant 4 : index
    %c0_101 = arith.constant 0 : index
    %126 = vector.load %arg12[%c0_99, %c4_100, %c0_101] : memref<2x24x32xf32, #tpu.memory_space<vmem>>, vector<2x16x32xf32>
    %127 = vector.shape_cast %126 : vector<2x16x32xf32> to vector<32x32xf32>
    %c96_102 = arith.constant 96 : index
    %c0_103 = arith.constant 0 : index
    %128 = vector.load %arg7[%c96_102, %c0_103] : memref<224x32xf32, #tpu.memory_space<vmem>>, vector<32x32xf32>
    %cst_104 = arith.constant dense<0.000000e+00> : vector<32x32xf32>
    %129 = tpu.matmul %127, %128, %cst_104 {dimension_numbers = #tpu.dot_dimension_numbers<[1], [0], [0], [1], [0, 0, 1, 1], [], []>} : vector<32x32xf32>, vector<32x32xf32>, vector<32x32xf32> -> vector<32x32xf32>
    %130 = arith.addf %125, %129 : vector<32x32xf32>
    %c0_105 = arith.constant 0 : index
    %c5_106 = arith.constant 5 : index
    %c0_107 = arith.constant 0 : index
    %131 = vector.load %arg12[%c0_105, %c5_106, %c0_107] : memref<2x24x32xf32, #tpu.memory_space<vmem>>, vector<2x16x32xf32>
    %132 = vector.shape_cast %131 : vector<2x16x32xf32> to vector<32x32xf32>
    %c128_108 = arith.constant 128 : index
    %c0_109 = arith.constant 0 : index
    %133 = vector.load %arg7[%c128_108, %c0_109] : memref<224x32xf32, #tpu.memory_space<vmem>>, vector<32x32xf32>
    %cst_110 = arith.constant dense<0.000000e+00> : vector<32x32xf32>
    %134 = tpu.matmul %132, %133, %cst_110 {dimension_numbers = #tpu.dot_dimension_numbers<[1], [0], [0], [1], [0, 0, 1, 1], [], []>} : vector<32x32xf32>, vector<32x32xf32>, vector<32x32xf32> -> vector<32x32xf32>
    %135 = arith.addf %130, %134 : vector<32x32xf32>
    %c0_111 = arith.constant 0 : index
    %c6_112 = arith.constant 6 : index
    %c0_113 = arith.constant 0 : index
    %136 = vector.load %arg12[%c0_111, %c6_112, %c0_113] : memref<2x24x32xf32, #tpu.memory_space<vmem>>, vector<2x16x32xf32>
    %137 = vector.shape_cast %136 : vector<2x16x32xf32> to vector<32x32xf32>
    %c160 = arith.constant 160 : index
    %c0_114 = arith.constant 0 : index
    %138 = vector.load %arg7[%c160, %c0_114] : memref<224x32xf32, #tpu.memory_space<vmem>>, vector<32x32xf32>
    %cst_115 = arith.constant dense<0.000000e+00> : vector<32x32xf32>
    %139 = tpu.matmul %137, %138, %cst_115 {dimension_numbers = #tpu.dot_dimension_numbers<[1], [0], [0], [1], [0, 0, 1, 1], [], []>} : vector<32x32xf32>, vector<32x32xf32>, vector<32x32xf32> -> vector<32x32xf32>
    %140 = arith.addf %135, %139 : vector<32x32xf32>
    %c0_116 = arith.constant 0 : index
    %c7 = arith.constant 7 : index
    %c0_117 = arith.constant 0 : index
    %141 = vector.load %arg12[%c0_116, %c7, %c0_117] : memref<2x24x32xf32, #tpu.memory_space<vmem>>, vector<2x16x32xf32>
    %142 = vector.shape_cast %141 : vector<2x16x32xf32> to vector<32x32xf32>
    %c192 = arith.constant 192 : index
    %c0_118 = arith.constant 0 : index
    %143 = vector.load %arg7[%c192, %c0_118] : memref<224x32xf32, #tpu.memory_space<vmem>>, vector<32x32xf32>
    %cst_119 = arith.constant dense<0.000000e+00> : vector<32x32xf32>
    %144 = tpu.matmul %142, %143, %cst_119 {dimension_numbers = #tpu.dot_dimension_numbers<[1], [0], [0], [1], [0, 0, 1, 1], [], []>} : vector<32x32xf32>, vector<32x32xf32>, vector<32x32xf32> -> vector<32x32xf32>
    %145 = arith.addf %140, %144 : vector<32x32xf32>
    %c0_120 = arith.constant 0 : index
    %c0_121 = arith.constant 0 : index
    %146 = vector.load %arg8[%c0_120, %c0_121] : memref<1x32xf32, #tpu.memory_space<vmem>>, vector<1x32xf32>
    %147 = vector.broadcast %146 : vector<1x32xf32> to vector<32x32xf32>
    %148 = arith.addf %145, %147 : vector<32x32xf32>
    %cst_122 = arith.constant 0.000000e+00 : f32
    %149 = vector.broadcast %cst_122 : f32 to vector<32x32xf32>
    %150 = arith.cmpf ogt, %148, %149 : vector<32x32xf32>
    %151 = math.exp %148 : vector<32x32xf32>
    %cst_123 = arith.constant 1.000000e+00 : f32
    %152 = vector.broadcast %cst_123 : f32 to vector<32x32xf32>
    %153 = arith.subf %151, %152 : vector<32x32xf32>
    %cst_124 = arith.constant 1.67326319 : f32
    %154 = vector.broadcast %cst_124 : f32 to vector<32x32xf32>
    %155 = arith.mulf %154, %153 : vector<32x32xf32>
    %156 = arith.select %150, %148, %155 : vector<32x32xi1>, vector<32x32xf32>
    %cst_125 = arith.constant 1.05070102 : f32
    %157 = vector.broadcast %cst_125 : f32 to vector<32x32xf32>
    %158 = arith.mulf %157, %156 : vector<32x32xf32>
    %159 = vector.shape_cast %158 : vector<32x32xf32> to vector<2x16x32xf32>
    %160 = vector.broadcast %1 : vector<2x16x1xf32> to vector<2x16x32xf32>
    %161 = arith.mulf %159, %160 : vector<2x16x32xf32>
    %cst_126 = arith.constant dense<0xFF800000> : vector<2x32xf32>
    %162 = vector.multi_reduction <maximumf>, %161, %cst_126 [1] : vector<2x16x32xf32> to vector<2x32xf32>
    %163 = vector.shape_cast %29 : vector<2x32xf32> to vector<2x1x32xf32>
    %c0_127 = arith.constant 0 : index
    %c0_128 = arith.constant 0 : index
    %c0_129 = arith.constant 0 : index
    %164 = vector.load %arg11[%c0_127, %c0_128, %c0_129] : memref<2x2x32xf32, #tpu.memory_space<vmem>>, vector<2x1x32xf32>
    tpu.vector_store %arg11[%c0_127, %c0_128, %c0_129], %163 {strides = array<i32>} : memref<2x2x32xf32, #tpu.memory_space<vmem>>, vector<2x1x32xf32>,
    %165 = vector.shape_cast %162 : vector<2x32xf32> to vector<2x1x32xf32>
    %c0_130 = arith.constant 0 : index
    %c1_131 = arith.constant 1 : index
    %c0_132 = arith.constant 0 : index
    %166 = vector.load %arg11[%c0_130, %c1_131, %c0_132] : memref<2x2x32xf32, #tpu.memory_space<vmem>>, vector<2x1x32xf32>
    tpu.vector_store %arg11[%c0_130, %c1_131, %c0_132], %165 {strides = array<i32>} : memref<2x2x32xf32, #tpu.memory_space<vmem>>, vector<2x1x32xf32>,
    return
  }
  func.func @transform_0(%arg0: i32) -> (i32, i32, i32) {
    %c0_i32 = arith.constant 0 : i32
    %c0_i32_0 = arith.constant 0 : i32
    %c0_i32_1 = arith.constant 0 : i32
    return %arg0, %c0_i32, %c0_i32_0 : i32, i32, i32
  }
  func.func @transform_1(%arg0: i32) -> (i32, i32, i32) {
    %c0_i32 = arith.constant 0 : i32
    %c0_i32_0 = arith.constant 0 : i32
    %c0_i32_1 = arith.constant 0 : i32
    return %arg0, %c0_i32, %c0_i32_0 : i32, i32, i32
  }
  func.func @transform_2(%arg0: i32) -> (i32, i32) {
    %c0_i32 = arith.constant 0 : i32
    %c0_i32_0 = arith.constant 0 : i32
    %c0_i32_1 = arith.constant 0 : i32
    return %c0_i32, %c0_i32_0 : i32, i32
  }
  func.func @transform_3(%arg0: i32) -> (i32, i32) {
    %c0_i32 = arith.constant 0 : i32
    %c0_i32_0 = arith.constant 0 : i32
    %c0_i32_1 = arith.constant 0 : i32
    return %c0_i32, %c0_i32_0 : i32, i32
  }
  func.func @transform_4(%arg0: i32) -> (i32, i32) {
    %c0_i32 = arith.constant 0 : i32
    %c0_i32_0 = arith.constant 0 : i32
    %c0_i32_1 = arith.constant 0 : i32
    return %c0_i32, %c0_i32_0 : i32, i32
  }
  func.func @transform_5(%arg0: i32) -> (i32, i32) {
    %c0_i32 = arith.constant 0 : i32
    %c0_i32_0 = arith.constant 0 : i32
    %c0_i32_1 = arith.constant 0 : i32
    return %c0_i32, %c0_i32_0 : i32, i32
  }
  func.func @transform_6(%arg0: i32) -> (i32, i32) {
    %c0_i32 = arith.constant 0 : i32
    %c0_i32_0 = arith.constant 0 : i32
    %c0_i32_1 = arith.constant 0 : i32
    return %c0_i32, %c0_i32_0 : i32, i32
  }
  func.func @transform_7(%arg0: i32) -> (i32, i32) {
    %c0_i32 = arith.constant 0 : i32
    %c0_i32_0 = arith.constant 0 : i32
    %c0_i32_1 = arith.constant 0 : i32
    return %c0_i32, %c0_i32_0 : i32, i32
  }
  func.func @transform_8(%arg0: i32) -> (i32, i32) {
    %c0_i32 = arith.constant 0 : i32
    %c0_i32_0 = arith.constant 0 : i32
    %c0_i32_1 = arith.constant 0 : i32
    return %c0_i32, %c0_i32_0 : i32, i32
  }
  func.func @transform_9(%arg0: i32) -> i32 {
    %c0_i32 = arith.constant 0 : i32
    %c0_i32_0 = arith.constant 0 : i32
    return %c0_i32 : i32
  }
  func.func @transform_10(%arg0: i32) -> (i32, i32, i32) {
    %c0_i32 = arith.constant 0 : i32
    %c0_i32_0 = arith.constant 0 : i32
    %c0_i32_1 = arith.constant 0 : i32
    return %arg0, %c0_i32, %c0_i32_0 : i32, i32, i32
  }
}

</mosaic_0001>

<bundles_post_ra>
// kernel: tpu_custom_call.1
= control target key start
LH: loop header
LB: loop body
LE: loop exit
PB: predicated region body
PF: predicated region fallthrough
CT: control target
= control target key end

     0   :  { %s3721_s0 = inlined_call_operand.vmem [shape: f32[6,16,32], index: 0, kind: input, shape index: {}]   ;;  %s3722_s1 = inlined_call_operand.vmem [shape: f32[6,16,1], index: 1, kind: input, shape index: {}]   ;;  %s3723_s2 = inlined_call_operand.vmem [shape: f32[96,32], index: 2, kind: input, shape index: {}]   ;;  %s3724_s3 = inlined_call_operand.vmem [shape: f32[1,32], index: 3, kind: input, shape index: {}]   ;;  %s3725_s4 = inlined_call_operand.vmem [shape: f32[160,32], index: 4, kind: input, shape index: {}]   ;;  %s3726_s5 = inlined_call_operand.vmem [shape: f32[1,32], index: 5, kind: input, shape index: {}]   ;;  %s3727_s6 = inlined_call_operand.vmem [shape: f32[224,32], index: 6, kind: input, shape index: {}]   ;;  %s3728_s7 = inlined_call_operand.vmem [shape: f32[1,32], index: 7, kind: input, shape index: {}]   ;;  %s3729_s8 = inlined_call_operand.vmem [shape: f32[1,32], index: 8, kind: input, shape index: {}]   ;;  %s3730_s9 = inlined_call_operand.<no memory space> [shape: f32[1], index: 9, kind: input, shape index: {}]   ;;  %s3731_s10 = inlined_call_operand.hbm [shape: f32[6,2,32], index: 10, kind: output, shape index: {}]  }
   0x1   :  { %15 = sst [smem:[#allocation3]] %s3730_s9 }
   0x2   :  { %16 = vsyncpa [#allocation5], 0 }
   0x3   :  { %18 = vsyncpa [#allocation5 + $0x1], 0  ;;  %s3230_s15 = smov 0   ;;  %s3232_s16 = smov 0  }
   0x4   :  { %s3234_s17 = smov 0   ;;  %s3236_s18 = smov 0  }
   0x5 LB: > { %s3251_s9 = sadd.s32 4294967295, %s3165_s18   ;;  %s2425_s19 = sadd.s32 4294967294, %s3165_s18   ;;  %s3165_s18 = sphi %s3236_s18, %s3737_s18   ;;  %s3161_s17 = sphi %s3234_s17, %s3736_s17   ;;  %s3157_s16 = sphi %s3232_s16, %s3735_s16   ;;  %s3153_s15 = sphi %s3230_s15, %s3734_s15  }
   0x6   : > { %s3255_s20 = sadd.s32 1, %s3165_s18   ;;  %s251_s21 = sadd.s32 1, %s3161_s17 }
   0x7   : > { %s248_s22 = ssub.s32 %s3165_s18, %s3255_s20  ;;  %p261_p0 = scmp.ne.s32.totalorder %s3161_s17, %s3157_s16 }
   0x8   : > { %p249_p1 = scmp.eq.s32.totalorder %s248_s22, 0  ;;  %p262_p2 = scmp.eq.s32.totalorder %s3251_s9, 2 }
   0x9   : > { %p267_p3 = scmp.ne.s32.totalorder %s3157_s16, %s3153_s15  ;;  %p268_p4 = scmp.eq.s32.totalorder %s2425_s19, 2 }
   0xa   : > { %s3266_s23 = scalar_select %p249_p1, %s3161_s17, %s251_s21  }
   0xb   : > { %p3268_p5 = por %p262_p2, %p261_p0  ;;  %p3272_p6 = por %p268_p4, %p267_p3 }
   0xc   : > { %p2428_p7 = scmp.ge.s32.totalorder %s3165_s18, 1  ;;  %p330_p8 = scmp.lt.s32.totalorder %s3165_s18, 4 }
   0xe   : > { %p331_p9 = pnand %p2428_p7, %p330_p8 }
   0xf   : > { %s2430_s26 = sshll.u32 (!%p331_p9), %s3251_s9, 1  ;;  %v3167_v0 = vmov (!%p331_p9), 0   ;;  %vm557_vm0 = vcmask (!%p331_p9), 257024   ;;  %v3168_v5 = vmov (!%p331_p9), 0.0   ;;  %v578_v6 = vld [vmem:[%s3723_s2 + $0x20] sm:$0xff] (!%p331_p9)  ;;  %v579_v7 = vld [vmem:[%s3723_s2 + $0x28] sm:$0xff] (!%p331_p9) }
  0x10   : > { %334 = sbr.rel (%p331_p9) target bundleno = 1018 (0x3fa), region = 60  ;;  %3066 = vset.pattern.permute.xlu1 (!%p331_p9), %v3167_v0  ;;  %3065 = vset.pattern.permute.xlu0 (!%p331_p9), %v3167_v0  ;;  %p376_p10 = scmp.lt.s32.totalorder (!%p331_p9), %s2430_s26, 5  ;;  %560 = vst.msk [vmem:[#allocation2 + $0x14] sm:$0xf] (!%p331_p9), %vm557_vm0, %v3168_v5  ;;  %558 = vst.msk [vmem:[#allocation2] sm:$0xf] (!%p331_p9), %vm557_vm0, %v3168_v5  ;;  %v2850_v10 = vpack.c.bf16 (!%p331_p9), %v579_v7, %v578_v6 }
  0x11   : > { %559 = vst.msk [vmem:[#allocation2 + $0x18] sm:$0xf] (!%p331_p9), %vm557_vm0, %v3168_v5  ;;  %561 = vst.msk [vmem:[#allocation2 + $0x2c] sm:$0xf] (!%p331_p9), %vm557_vm0, %v3168_v5  ;;  %v780_v8 = vld [vmem:[%s3723_s2 + $0x40] sm:$0xff] (!%p331_p9)  ;;  %v781_v9 = vld [vmem:[%s3723_s2 + $0x48] sm:$0xff] (!%p331_p9) }
  0x12   : > { %v2866_v11 = vpack.c.bf16 (!%p331_p9), %v781_v9, %v780_v8  ;;  %v580_v12 = vld [vmem:[%s3723_s2 + $0x30] sm:$0xff] (!%p331_p9)  ;;  %v581_v13 = vld [vmem:[%s3723_s2 + $0x38] sm:$0xff] (!%p331_p9)  ;;  %2851 = vmatprep.subr.bf16.mxu1 (!%p331_p9), %v2850_v10  ;;  %v570_v18 = vld [vmem:[%s3723_s2] sm:$0xff] (!%p331_p9)  ;;  %vm433_vm1 = vcmask (!%p331_p9), 261120   ;;  %s446_s12 = sld [smem:[#allocation3]] (!%p331_p9)  ;;  %vm460_vm4 = vcmask (!%p331_p9), 7168  }
  0x13   : > { %v2854_v14 = vpack.c.bf16 (!%p331_p9), %v581_v13, %v580_v12  ;;  %2853 = vmatpush3.bf16.msra.mxu1 (!%p331_p9), %v2850_v10  ;;  %v782_v15 = vld [vmem:[%s3723_s2 + $0x50] sm:$0xff] (!%p331_p9)  ;;  %v783_v16 = vld [vmem:[%s3723_s2 + $0x58] sm:$0xff] (!%p331_p9)  ;;  %v571_v19 = vld [vmem:[%s3723_s2 + $0x8] sm:$0xff] (!%p331_p9)  ;;  %s372_s19 = sand.u32 (!%p331_p9), 1, %s3157_s16   ;;  %vm2332_vm11 = vcmask (!%p331_p9), 253952   ;;  %s2519_s21 = sshll.u32 (!%p331_p9), %s3251_s9, 6 }
  0x14   : > { %2867 = vmatprep.subr.bf16.mxu0 (!%p331_p9), %v2866_v11  ;;  %v2870_v17 = vpack.c.bf16 (!%p331_p9), %v783_v16, %v782_v15  ;;  %v2858_v20 = vpack.c.bf16 (!%p331_p9), %v571_v19, %v570_v18  ;;  %v2436_v25 = vld [vmem:[%s3729_s8] ss:$0 sm:$0xff] (!%p331_p9)  ;;  %v572_v42 = vld [vmem:[%s3723_s2 + $0x10] sm:$0xff] (!%p331_p9)  ;;  %v573_v43 = vld [vmem:[%s3723_s2 + $0x18] sm:$0xff] (!%p331_p9)  ;;  %s3680_s9 = scalar_lea.sflag (!%p331_p9), [#allocation5], %s372_s19 }
  0x15   : > { %2869 = vmatpush3.bf16.msra.mxu0 (!%p331_p9), %v2866_v11  ;;  %2855 = vmatprep.subr.bf16.mxu1 (!%p331_p9), %v2854_v14  ;;  %v2862_v46 = vpack.c.bf16 (!%p331_p9), %v573_v43, %v572_v42  ;;  %v944_v57 = vld [vmem:[%s3725_s4 + $0x20] sm:$0xff] (!%p331_p9)  ;;  %v945_v58 = vld [vmem:[%s3725_s4 + $0x28] sm:$0xff] (!%p331_p9)  ;;  %v946_v60 = vld [vmem:[%s3725_s4 + $0x30] sm:$0xff] (!%p331_p9) }
  0x16   : > { %2871 = vmatprep.subr.bf16.mxu0 (!%p331_p9), %v2870_v17  ;;  %v2874_v59 = vpack.c.bf16 (!%p331_p9), %v945_v58, %v944_v57  ;;  %v947_v61 = vld [vmem:[%s3725_s4 + $0x38] sm:$0xff] (!%p331_p9)  ;;  %v936_v63 = vld [vmem:[%s3725_s4] sm:$0xff] (!%p331_p9)  ;;  %v937_v0 = vld [vmem:[%s3725_s4 + $0x8] sm:$0xff] (!%p331_p9) }
  0x17   : > { %s3739_s26 = smov (!%p376_p10, %s2430_s26), 5  ;;  %2857 = vmatpush3.bf16.msra.mxu1 %v2854_v14  ;;  %v2878_v62 = vpack.c.bf16 %v947_v61, %v946_v60  ;;  %v3409_v5 = vpack.c.bf16 %v937_v0, %v936_v63 }
  0x18   : > { %s2517_s27 = sshll.u32 %s3739_s26, 4  ;;  %2859 = vmatprep.subr.bf16.mxu1 %v2858_v20  ;;  %v447_v6 = vstv %s446_s12  ;;  %s2429_s26 = sshll.u32 %s372_s19, 2 }
  0x19   : > { %s387_s30 = scalar_lea.vmem %s3722_s1, %s2517_s27  ;;  %2873 = vmatpush3.bf16.msra.mxu0 %v2870_v17  ;;  %s380_s13 = scalar_lea.vmem %s3721_s0, %s2517_s27 }
  0x1a   : > { %v3287_v1 = vld [vmem:[%s387_s30 + $0x10] sm:$0xff]  ;;  %v3289_v2 = vld [vmem:[%s387_s30] sm:$0xff]  ;;  %v3293_v3 = vld [vmem:[%s387_s30 + $0x18] sm:$0xff]  ;;  %s3509_s27 = scalar_lea.vmem [#allocation4], %s2429_s26  ;;  %s3169_s12 = smov [#allocation4]  }
  0x1b   : > { %410 = vperm.xlu1 %3066, %v3287_v1   ;;  %400 = vperm.xlu0 %3065, %v3289_v2   ;;  %v3295_v4 = vld [vmem:[%s387_s30 + $0x8] sm:$0xff]  ;;  %v392_v21 = vld [vmem:[%s380_s13 + $0x10] sm:$0xff]  ;;  %v390_v22 = vld [vmem:[%s380_s13] sm:$0xff]  ;;  %vm452_vm2 = vcmp.eq.f32.partialorder %v3289_v2, 0.0  ;;  %vm454_vm5 = vcmp.eq.f32.partialorder %v3287_v1, 0.0  ;;  %vm455_vm6 = vcmp.eq.f32.partialorder %v3293_v3, 0.0  ;;  %s3670_s30 = scalar_lea.hbm %s3731_s10, %s2519_s21 }
  0x1c   : > { %v393_v28 = vld [vmem:[%s380_s13 + $0x18] sm:$0xff]  ;;  %v391_v29 = vld [vmem:[%s380_s13 + $0x8] sm:$0xff]  ;;  %vm453_vm3 = vcmp.eq.f32.partialorder %v3295_v4, 0.0  ;;  %s2351_s22 = sshll.u32 %s3509_s27, 4  ;;  %s3107_s13 = sshll.u32 %s3169_s12, 4  ;;  %s3672_s22 = int_to_ptr.vmem [resolvable:$true] %s2351_s22  ;;  %s3108_s13 = int_to_ptr.vmem [resolvable:$false] %s3107_s13 }
  0x1d   : > { %s3103_s11 = scalar_lea.vmem %s3672_s22, 64  ;;  %s3109_s14 = scalar_lea.vmem %s3108_s13, 128 }
  0x1e   : > { %p3104_p11 = scmp.ne.s32.totalorder %s3672_s22, %s3103_s11  ;;  %p3110_p0 = scmp.lt.s32.totalorder %s3672_s22, %s3108_s13 }
  0x1f   : > { %415 = vperm.xlu1 %3066, %v3293_v3   ;;  %405 = vperm.xlu0 %3065, %v3295_v4   ;;  %p3111_p1 = scmp.lt.s32.totalorder %s3109_s14, %s3103_s11 }
  0x20   : > { %p3105_p12 = pnand %p3104_p11, %p3268_p5 }
  0x21   : > { %p3112_p2 = por %p3111_p1, %p3110_p0 }
  0x22   : > { %p3106_p13 = pneg %p3105_p12 }
  0x24   : > { %p3113_p3 = pnand %p3112_p2, %p3106_p13 }
  0x9a   : > { %v3334_v23 = vpop.permute.xlu1 %410  ;;  %v3336_v24 = vpop.permute.xlu0 %400 }
  0x9b   : > { %v3342_v26 = vmul.f32 %v3334_v23, %v392_v21  ;;  %v3345_v27 = vmul.f32 %v3336_v24, %v390_v22 }
  0x9d   : > { %564 = vst.msk [vmem:[#allocation2 + $0x1c] sm:$0xff] %vm433_vm1, %v3342_v26  ;;  %562 = vst.msk [vmem:[#allocation2 + $0x4] sm:$0xff] %vm433_vm1, %v3345_v27  ;;  %v429_v30 = vmul.f32 %v2436_v25, %v3345_v27  ;;  %v431_v31 = vmul.f32 %v2436_v25, %v3342_v26 }
  0x9e   : > { %v3353_v32 = vpop.permute.xlu1 %415  ;;  %v3355_v33 = vpop.permute.xlu0 %405 }
  0x9f   : > { %v3358_v34 = vmul.f32 %v3353_v32, %v393_v28  ;;  %v3361_v35 = vmul.f32 %v3355_v33, %v391_v29  ;;  %v434_v36 = vsel %vm433_vm1, %v429_v30, 0.0  ;;  %v440_v38 = vsel %vm433_vm1, %v431_v31, 0.0 }
  0xa0   : > { %435 = vadd.xlane.f32.xlu0 %v434_v36 }
  0xa1   : > { %565 = vst.msk [vmem:[#allocation2 + $0x24] sm:$0xff] %vm433_vm1, %v3358_v34  ;;  %563 = vst.msk [vmem:[#allocation2 + $0xc] sm:$0xff] %vm433_vm1, %v3361_v35  ;;  %v430_v37 = vmul.f32 %v2436_v25, %v3361_v35  ;;  %v432_v40 = vmul.f32 %v2436_v25, %v3358_v34 }
  0xa3   : > { %v437_v39 = vsel %vm433_vm1, %v430_v37, 0.0  ;;  %v443_v44 = vsel %vm433_vm1, %v432_v40, 0.0 }
  0xa4   : > { %438 = vadd.xlane.f32.xlu1 %v437_v39  ;;  %441 = vadd.xlane.f32.xlu0 %v440_v38  ;;  %v574_v41 = vld [vmem:[#allocation2 + $0x4] sm:$0xff]  ;;  %v576_v45 = vld [vmem:[#allocation2 + $0x1c] sm:$0xff] }
  0xa5   : > { %2648 = vmatprep.mubr.msk.f32.mxu1 %vm433_vm1, %v574_v41  ;;  %v566_v52 = vld [vmem:[#allocation2 + $0x3] sm:$0xff]  ;;  %v568_v55 = vld [vmem:[#allocation2 + $0x1b] sm:$0xff] }
  0xa8   : > { %444 = vadd.xlane.f32.xlu0 %v443_v44  ;;  %v575_v47 = vld [vmem:[#allocation2 + $0xc] sm:$0xff]  ;;  %v778_v50 = vld [vmem:[#allocation2 + $0x1d] sm:$0xff] }
  0xa9   : > { %v776_v48 = vld [vmem:[#allocation2 + $0x5] sm:$0xff]  ;;  %v777_v49 = vld [vmem:[#allocation2 + $0xd] sm:$0xff]  ;;  %2649 = vmatmul.mubr.msk.f32.vlgmr.msra.gmra.mrb[0].mxu1 %vm433_vm1, %v575_v47 }
  0xaa   : > { %2676 = vmatprep.mubr.msk.f32.mxu0 %vm433_vm1, %v776_v48  ;;  %2861 = vmatpush3.bf16.msra.mxu1 %v2858_v20  ;;  %v577_v51 = vld [vmem:[#allocation2 + $0x24] sm:$0xff] }
  0xab   : > { %2651 = vmatprep.mubr.msk.f32.mxu1 %vm433_vm1, %v576_v45  ;;  %2677 = vmatmul.mubr.msk.f32.vlgmr.msra.gmra.mrb[0].mxu0 %vm433_vm1, %v777_v49  ;;  %v779_v53 = vld [vmem:[#allocation2 + $0x25] sm:$0xff] }
  0xac   : > { %2863 = vmatprep.subr.bf16.mxu1 %v2862_v46  ;;  %2679 = vmatprep.mubr.msk.f32.mxu0 %vm433_vm1, %v778_v50  ;;  %v567_v54 = vld [vmem:[#allocation2 + $0xb] sm:$0xff]  ;;  %v569_v56 = vld [vmem:[#allocation2 + $0x23] sm:$0xff] }
  0xad   : > { %2652 = vmatmul.mubr.msk.f32.gmra.mrb[2].mxu1 %vm433_vm1, %v577_v51 }
  0xae   : > { %2865 = vmatpush3.bf16.msra.mxu1 %v2862_v46  ;;  %2662 = vmatprep.mubr.msk.f32.mxu1 %vm433_vm1, %v566_v52 }
  0xaf   : > { %2680 = vmatmul.mubr.msk.f32.gmra.mrb[2].mxu0 %vm433_vm1, %v779_v53  ;;  %2875 = vmatprep.subr.bf16.mxu1 %v2874_v59 }
  0xb1   : > { %2663 = vmatmul.mubr.msk.f32.vlgmr.msra.gmra.mrb[0].mxu1 %vm433_vm1, %v567_v54 }
  0xb2   : > { %2665 = vmatprep.mubr.msk.f32.mxu1 %vm433_vm1, %v568_v55  ;;  %2877 = vmatpush3.bf16.msra.mxu1 %v2874_v59 }
  0xb3   : > { %2879 = vmatprep.subr.bf16.mxu1 %v2878_v62 }
  0xb5   : > { %2666 = vmatmul.mubr.msk.f32.gmra.mrb[2].mxu1 %vm433_vm1, %v569_v56 }
  0xb6   : > { %2881 = vmatpush3.bf16.msra.mxu1 %v2878_v62 }
  0xb7   : > { %2883 = vmatprep.subr.bf16.mxu1 %v3409_v5 }
 0x12d   : > { %v436_v7 = vpop.xlane.xlu0 %435 }
 0x12e   : > { %v448_v8 = vadd.f32 %v447_v6, %v436_v7 }
 0x130   : > { %v456_v11 = vsel %vm452_vm2, -inf, %v448_v8 }
 0x131   : > { %v439_v9 = vpop.xlane.xlu1 %438  ;;  %v442_v10 = vpop.xlane.xlu0 %441  ;;  %v461_v15 = vsel %vm460_vm4, %v456_v11, -inf }
 0x132   : > { %v449_v12 = vadd.f32 %v447_v6, %v439_v9  ;;  %v450_v13 = vadd.f32 %v447_v6, %v442_v10 }
 0x134   : > { %v457_v14 = vsel %vm453_vm3, -inf, %v449_v12  ;;  %v458_v2 = vsel %vm454_vm5, -inf, %v450_v13 }
 0x135   : > { %v462_v16 = vsel %vm460_vm4, %v457_v14, -inf  ;;  %v445_v17 = vpop.xlane.xlu0 %444  ;;  %v470_v21 = vsel %vm460_vm4, %v458_v2, -inf }
 0x136   : > { %v463_v18 = vmax.f32 %v461_v15, %v462_v16  ;;  %v451_v19 = vadd.f32 %v447_v6, %v445_v17 }
 0x138   : > { %v464_v4 = vrot.slane %v463_v18, 4  ;;  %v459_v20 = vsel %vm455_vm6, -inf, %v451_v19 }
 0x139   : > { %v471_v22 = vsel %vm460_vm4, %v459_v20, -inf }
 0x13a   : > { %v465_v25 = vmax.f32 %v463_v18, %v464_v4  ;;  %v472_v28 = vmax.f32 %v470_v21, %v471_v22  ;;  %v2449_v21 = vld [vmem:[%s3724_s3] ss:$0 sm:$0xff] }
 0x13c   : > { %v466_v1 = vrot.slane %v465_v25, 2  ;;  %v473_v29 = vrot.slane %v472_v28, 4 }
 0x13e   : > { %v467_v30 = vmax.f32 %v465_v25, %v466_v1  ;;  %v474_v3 = vmax.f32 %v472_v28, %v473_v29 }
 0x140   : > { %v468_v31 = vrot.slane %v467_v30, 1  ;;  %v475_v36 = vrot.slane %v474_v3, 2 }
 0x142   : > { %v469_v37 = vmax.f32 %v467_v30, %v468_v31  ;;  %v476_v38 = vmax.f32 %v474_v3, %v475_v36 }
 0x144   : > { %v479_v39 = vsub.f32 %v456_v11, %v469_v37  ;;  %v480_v40 = vsub.f32 %v457_v14, %v469_v37  ;;  %v477_v41 = vrot.slane %v476_v38, 1 }
 0x146   : > { %v483_v42 = vmul.f32 1.442695, %v479_v39  ;;  %v485_v43 = vmul.f32 1.442695, %v480_v40  ;;  %v478_v44 = vmax.f32 %v476_v38, %v477_v41 }
 0x148   : > { %3067 = vpow2.f32 %v483_v42  ;;  %v481_v45 = vsub.f32 %v458_v2, %v478_v44  ;;  %v482_v46 = vsub.f32 %v459_v20, %v478_v44 }
 0x149   : > { %3069 = vpow2.f32 %v485_v43 }
 0x14a   : > { %v487_v47 = vmul.f32 1.442695, %v481_v45  ;;  %v489_v48 = vmul.f32 1.442695, %v482_v46 }
 0x14c   : > { %3071 = vpow2.f32 %v487_v47 }
 0x14d   : > { %3073 = vpow2.f32 %v489_v48 }
 0x152   : > { %v3068_v49 = vpop.eup %3067 }
 0x153   : > { %v3070_v50 = vpop.eup %3069  ;;  %v491_v51 = vsel %vm460_vm4, %v3068_v49, 0.0 }
 0x154   : > { %v492_v52 = vsel %vm460_vm4, %v3070_v50, 0.0 }
 0x155   : > { %v493_v53 = vadd.f32 %v492_v52, %v491_v51 }
 0x156   : > { %v3072_v54 = vpop.eup %3071 }
 0x157   : > { %v3074_v55 = vpop.eup %3073  ;;  %v494_v56 = vrot.slane %v493_v53, 4  ;;  %v500_v57 = vsel %vm460_vm4, %v3072_v54, 0.0 }
 0x158   : > { %v501_v58 = vsel %vm460_vm4, %v3074_v55, 0.0 }
 0x159   : > { %v495_v59 = vadd.f32 %v494_v56, %v493_v53  ;;  %v502_v60 = vadd.f32 %v501_v58, %v500_v57 }
 0x15b   : > { %v503_v61 = vrot.slane %v502_v60, 4  ;;  %v496_v62 = vrot.slane %v495_v59, 2 }
 0x15d   : > { %v504_v63 = vadd.f32 %v503_v61, %v502_v60  ;;  %v497_v0 = vadd.f32 %v496_v62, %v495_v59 }
 0x15f   : > { %v498_v6 = vrot.slane %v497_v0, 1  ;;  %v505_v7 = vrot.slane %v504_v63, 2 }
 0x161   : > { %v499_v8 = vadd.f32 %v498_v6, %v497_v0  ;;  %v506_v9 = vadd.f32 %v505_v7, %v504_v63 }
 0x163   : > { %3075 = vrcp.f32 %v499_v8  ;;  %v507_v10 = vrot.slane %v506_v9, 1  ;;  %v938_v8 = vld [vmem:[%s3725_s4 + $0x10] sm:$0xff] }
 0x165   : > { %v508_v11 = vadd.f32 %v507_v10, %v506_v9  ;;  %v939_v9 = vld [vmem:[%s3725_s4 + $0x18] sm:$0xff] }
 0x167   : > { %3077 = vrcp.f32 %v508_v11 }
 0x16d   : > { %v3076_v12 = vpop.eup %3075 }
 0x16e   : > { %v512_v13 = vmul.f32 %v3076_v12, %v3070_v50  ;;  %v511_v14 = vmul.f32 %v3076_v12, %v3068_v49  ;;  %v2886_v12 = vpack.c.bf16 %v939_v9, %v938_v8 }
 0x170   : > { %522 = vperm.xlu0 %3065, %v512_v13   ;;  %517 = vperm.xlu1 %3066, %v511_v14   ;;  %v1146_v13 = vld [vmem:[%s3725_s4 + $0x40] sm:$0xff]  ;;  %v1147_v14 = vld [vmem:[%s3725_s4 + $0x48] sm:$0xff] }
 0x171   : > { %v3078_v15 = vpop.eup %3077 }
 0x172   : > { %v513_v16 = vmul.f32 %v3078_v15, %v3072_v54  ;;  %v514_v17 = vmul.f32 %v3078_v15, %v3074_v55 }
 0x174   : > { %527 = vperm.xlu1 %3066, %v513_v16  }
 0x178   : > { %532 = vperm.xlu1 %3066, %v514_v17   ;;  %v2890_v17 = vpack.c.bf16 %v1147_v14, %v1146_v13 }
 0x17e   : > { %v2678_v18 = vpop.f32.mrb[0].mxu0 }
 0x17f   : > { %v862_v2 = vpop.f32.mrb[1].mxu0 }
 0x182   : > { %v2681_v19 = vpop.f32.mrb[2].mxu0 }
 0x183   : > { %v872_v4 = vpop.f32.mrb[3].mxu0 }
 0x184   : > { %v2664_v20 = vpop.f32.mrb[0].mxu1 }
 0x185   : > { %v2974_v22 = vadd.f32 %v2678_v18, %v2664_v20  ;;  %v757_v25 = vpop.f32.mrb[1].mxu1  ;;  %v1148_v18 = vld [vmem:[%s3725_s4 + $0x50] sm:$0xff]  ;;  %v1255_v20 = vld [vmem:[%s3725_s4 + $0x60] sm:$0xff] }
 0x186   : > { %v2975_v28 = vadd.f32 %v862_v2, %v757_v25  ;;  %v1149_v2 = vld [vmem:[%s3725_s4 + $0x58] sm:$0xff] }
 0x187   : > { %v893_v1 = vadd.f32 %v2974_v22, %v2449_v21 }
 0x188   : > { %v892_v29 = vadd.f32 %v2975_v28, %v2449_v21  ;;  %v2667_v30 = vpop.f32.mrb[2].mxu1 }
 0x189   : > { %v902_v3 = vmul.f32 1.442695, %v893_v1  ;;  %v2976_v31 = vadd.f32 %v2681_v19, %v2667_v30  ;;  %v767_v36 = vpop.f32.mrb[3].mxu1  ;;  %vm897_vm7 = vcmp.gt.f32.partialorder %v893_v1, 0.0 }
 0x18a   : > { %v900_v37 = vmul.f32 1.442695, %v892_v29  ;;  %v2977_v38 = vadd.f32 %v872_v4, %v767_v36  ;;  %vm896_vm8 = vcmp.gt.f32.partialorder %v892_v29, 0.0  ;;  %v1364_v36 = vld [vmem:[%s3725_s4 + $0x80] sm:$0xff] }
 0x18b   : > { %3079 = vpow2.f32 %v902_v3  ;;  %v895_v39 = vadd.f32 %v2976_v31, %v2449_v21 }
 0x18c   : > { %3081 = vpow2.f32 %v900_v37  ;;  %v894_v40 = vadd.f32 %v2977_v38, %v2449_v21  ;;  %v1256_v21 = vld [vmem:[%s3725_s4 + $0x68] sm:$0xff] }
 0x18d   : > { %v906_v41 = vmul.f32 1.442695, %v895_v39  ;;  %vm899_vm9 = vcmp.gt.f32.partialorder %v895_v39, 0.0  ;;  %v2898_v25 = vpack.c.bf16 %v1256_v21, %v1255_v20  ;;  %v1365_v37 = vld [vmem:[%s3725_s4 + $0x88] sm:$0xff]  ;;  %v1520_v21 = vld [vmem:[%s3727_s6] sm:$0xff] }
 0x18e   : > { %v904_v42 = vmul.f32 1.442695, %v894_v40  ;;  %vm898_vm10 = vcmp.gt.f32.partialorder %v894_v40, 0.0 }
 0x18f   : > { %3083 = vpow2.f32 %v906_v41  ;;  %v1366_v41 = vld [vmem:[%s3725_s4 + $0x90] sm:$0xff] }
 0x190   : > { %3085 = vpow2.f32 %v904_v42  ;;  %v1367_v42 = vld [vmem:[%s3725_s4 + $0x98] sm:$0xff] }
 0x195   : > { %v3080_v43 = vpop.eup %3079 }
 0x196   : > { %v3082_v44 = vpop.eup %3081  ;;  %v2451_v45 = vadd.f32 -1.0, %v3080_v43 }
 0x197   : > { %v2450_v46 = vadd.f32 -1.0, %v3082_v44  ;;  %v2910_v44 = vpack.c.bf16 %v1367_v42, %v1366_v41 }
 0x198   : > { %v913_v47 = vmul.f32 1.6732632, %v2451_v45 }
 0x199   : > { %v3084_v48 = vpop.eup %3083  ;;  %v912_v49 = vmul.f32 1.6732632, %v2450_v46 }
 0x19a   : > { %v3086_v50 = vpop.eup %3085  ;;  %v917_v51 = vsel %vm897_vm7, %v893_v1, %v913_v47  ;;  %v2453_v52 = vadd.f32 -1.0, %v3084_v48  ;;  %v1257_v1 = vld [vmem:[%s3725_s4 + $0x70] sm:$0xff] }
 0x19b   : > { %v921_v53 = vmul.f32 1.050701, %v917_v51  ;;  %v916_v54 = vsel %vm896_vm8, %v892_v29, %v912_v49  ;;  %v2452_v55 = vadd.f32 -1.0, %v3086_v50  ;;  %v1258_v29 = vld [vmem:[%s3725_s4 + $0x78] sm:$0xff] }
 0x19c   : > { %v920_v56 = vmul.f32 1.050701, %v916_v54  ;;  %v915_v57 = vmul.f32 1.6732632, %v2453_v52  ;;  %v2902_v3 = vpack.c.bf16 %v1258_v29, %v1257_v1  ;;  %v2169_v1 = vld [vmem:[%s3727_s6 + $0xd8] sm:$0xff] }
 0x19d   : > { %v925_v58 = vmul.f32 %v921_v53, %v3355_v33  ;;  %v914_v59 = vmul.f32 1.6732632, %v2452_v55 }
 0x19e   : > { %v924_v60 = vmul.f32 %v920_v56, %v3336_v24  ;;  %v919_v61 = vsel %vm899_vm9, %v895_v39, %v915_v57  ;;  %v2906_v39 = vpack.c.bf16 %v1365_v37, %v1364_v36 }
 0x19f   : > { %929 = vst.msk [vmem:[#allocation2 + $0xc] sm:$0xff] %vm433_vm1, %v925_v58  ;;  %v923_v62 = vmul.f32 1.050701, %v919_v61  ;;  %v918_v63 = vsel %vm898_vm10, %v894_v40, %v914_v59 }
 0x1a0   : > { %928 = vst.msk [vmem:[#allocation2 + $0x4] sm:$0xff] %vm433_vm1, %v924_v60  ;;  %v922_v0 = vmul.f32 1.050701, %v918_v63 }
 0x1a1   : > { %v927_v6 = vmul.f32 %v923_v62, %v3353_v32 }
 0x1a2   : > { %v926_v7 = vmul.f32 %v922_v0, %v3334_v23 }
 0x1a3   : > { %931 = vst.msk [vmem:[#allocation2 + $0x24] sm:$0xff] %vm433_vm1, %v927_v6 }
 0x1a4   : > { %930 = vst.msk [vmem:[#allocation2 + $0x1c] sm:$0xff] %vm433_vm1, %v926_v7 }
 0x1a6   : > { %v1143_v31 = vld [vmem:[#allocation2 + $0xc] sm:$0xff] }
 0x1a7   : > { %v940_v10 = vld [vmem:[#allocation2 + $0x3] sm:$0xff]  ;;  %v941_v11 = vld [vmem:[#allocation2 + $0xb] sm:$0xff] }
 0x1a8   : > { %2690 = vmatprep.mubr.msk.f32.mxu1 %vm433_vm1, %v940_v10  ;;  %v932_v19 = vld [vmem:[#allocation2 + $0x2] sm:$0xff]  ;;  %v933_v4 = vld [vmem:[#allocation2 + $0xa] sm:$0xff] }
 0x1a9   : > { %2691 = vmatmul.mubr.msk.f32.vlgmr.msra.gmra.mrb[4].mxu1 %vm433_vm1, %v941_v11  ;;  %v1142_v30 = vld [vmem:[#allocation2 + $0x4] sm:$0xff]  ;;  %v1252_v45 = vld [vmem:[#allocation2 + $0xd] sm:$0xff] }
 0x1aa   : > { %2885 = vmatpush3.bf16.msra.mxu1 %v3409_v5  ;;  %v2894_v5 = vpack.c.bf16 %v1149_v2, %v1148_v18  ;;  %v1145_v40 = vld [vmem:[#allocation2 + $0x24] sm:$0xff]  ;;  %v1361_v49 = vld [vmem:[#allocation2 + $0xe] sm:$0xff]  ;;  %v1531_v2 = vld [vmem:[%s3727_s6 + $0x38] sm:$0xff] }
 0x1ab   : > { %v942_v15 = vld [vmem:[#allocation2 + $0x1b] sm:$0xff]  ;;  %2887 = vmatprep.subr.bf16.mxu1 %v2886_v12  ;;  %v943_v16 = vld [vmem:[#allocation2 + $0x23] sm:$0xff]  ;;  %v1530_v18 = vld [vmem:[%s3727_s6 + $0x30] sm:$0xff] }
 0x1ac   : > { %2693 = vmatprep.mubr.msk.f32.mxu1 %vm433_vm1, %v942_v15  ;;  %v934_v22 = vld [vmem:[#allocation2 + $0x1a] sm:$0xff]  ;;  %v935_v28 = vld [vmem:[#allocation2 + $0x22] sm:$0xff] }
 0x1ad   : > { %2694 = vmatmul.mubr.msk.f32.gmra.mrb[6].mxu1 %vm433_vm1, %v943_v16  ;;  %v1144_v38 = vld [vmem:[#allocation2 + $0x1c] sm:$0xff]  ;;  %v1251_v43 = vld [vmem:[#allocation2 + $0x5] sm:$0xff] }
 0x1ae   : > { %2889 = vmatpush3.bf16.msra.mxu1 %v2886_v12  ;;  %2704 = vmatprep.mubr.msk.f32.mxu1 %vm433_vm1, %v932_v19  ;;  %v1253_v46 = vld [vmem:[#allocation2 + $0x1d] sm:$0xff]  ;;  %v1254_v47 = vld [vmem:[#allocation2 + $0x25] sm:$0xff] }
 0x1af   : > { %2891 = vmatprep.subr.bf16.mxu1 %v2890_v17  ;;  %v1360_v48 = vld [vmem:[#allocation2 + $0x6] sm:$0xff]  ;;  %v1362_v50 = vld [vmem:[#allocation2 + $0x1e] sm:$0xff] }
 0x1b0   : > { %v1363_v51 = vld [vmem:[#allocation2 + $0x26] sm:$0xff] }
 0x1b1   : > { %2705 = vmatmul.mubr.msk.f32.vlgmr.msra.gmra.mrb[4].mxu1 %vm433_vm1, %v933_v4  ;;  %v1528_v15 = vld [vmem:[%s3727_s6 + $0x20] sm:$0xff]  ;;  %v1529_v16 = vld [vmem:[%s3727_s6 + $0x28] sm:$0xff] }
 0x1b2   : > { %2893 = vmatpush3.bf16.msra.mxu1 %v2890_v17  ;;  %2707 = vmatprep.mubr.msk.f32.mxu1 %vm433_vm1, %v934_v22  ;;  %v2914_v17 = vpack.c.bf16 %v1529_v16, %v1528_v15  ;;  %v2166_v19 = vld [vmem:[%s3727_s6 + $0xc0] sm:$0xff]  ;;  %v2167_v4 = vld [vmem:[%s3727_s6 + $0xc8] sm:$0xff] }
 0x1b3   : > { %2895 = vmatprep.subr.bf16.mxu1 %v2894_v5  ;;  %v3533_v20 = vpack.c.bf16 %v2167_v4, %v2166_v19  ;;  %v1521_v22 = vld [vmem:[%s3727_s6 + $0x8] sm:$0xff]  ;;  %v1733_v19 = vld [vmem:[%s3727_s6 + $0x58] sm:$0xff] }
 0x1b4   : > { %2915 = vmatprep.subr.bf16.mxu0 %v2914_v17 }
 0x1b5   : > { %2708 = vmatmul.mubr.msk.f32.gmra.mrb[6].mxu1 %vm433_vm1, %v935_v28  ;;  %2917 = vmatpush3.bf16.msra.mxu0 %v2914_v17  ;;  %v3546_v28 = vpack.c.bf16 %v1521_v22, %v1520_v21  ;;  %v1839_v22 = vld [vmem:[%s3727_s6 + $0x60] sm:$0xff] }
 0x1b6   : > { %2897 = vmatpush3.bf16.msra.mxu1 %v2894_v5  ;;  %2718 = vmatprep.mubr.msk.f32.mxu1 %vm433_vm1, %v1142_v30  ;;  %v2918_v5 = vpack.c.bf16 %v1531_v2, %v1530_v18  ;;  %v2474_v30 = vld [vmem:[%s3726_s5] ss:$0 sm:$0xff]  ;;  %v1732_v2 = vld [vmem:[%s3727_s6 + $0x50] sm:$0xff] }
 0x1b7   : > { %2899 = vmatprep.subr.bf16.mxu1 %v2898_v25  ;;  %v2934_v4 = vpack.c.bf16 %v1733_v19, %v1732_v2 }
 0x1b8   : > { %2919 = vmatprep.subr.bf16.mxu0 %v2918_v5 }
 0x1b9   : > { %2719 = vmatmul.mubr.msk.f32.vlgmr.msra.gmra.mrb[4].mxu1 %vm433_vm1, %v1143_v31  ;;  %2921 = vmatpush3.bf16.msra.mxu0 %v2918_v5 }
 0x1ba   : > { %2901 = vmatpush3.bf16.msra.mxu1 %v2898_v25  ;;  %2721 = vmatprep.mubr.msk.f32.mxu1 %vm433_vm1, %v1144_v38  ;;  %v2168_v25 = vld [vmem:[%s3727_s6 + $0xd0] sm:$0xff] }
 0x1bb   : > { %2903 = vmatprep.subr.bf16.mxu1 %v2902_v3  ;;  %v3551_v29 = vpack.c.bf16 %v2169_v1, %v2168_v25  ;;  %2923 = vmatprep.subr.bf16.mxu0 %v3546_v28  ;;  %v1840_v25 = vld [vmem:[%s3727_s6 + $0x68] sm:$0xff] }
 0x1bc   : > { %v2938_v1 = vpack.c.bf16 %v1840_v25, %v1839_v22 }
 0x1bd   : > { %2722 = vmatmul.mubr.msk.f32.gmra.mrb[6].mxu1 %vm433_vm1, %v1145_v40 }
 0x1be   : > { %2905 = vmatpush3.bf16.msra.mxu1 %v2902_v3  ;;  %2732 = vmatprep.mubr.msk.f32.mxu1 %vm433_vm1, %v1251_v43 }
 0x1bf   : > { %2907 = vmatprep.subr.bf16.mxu1 %v2906_v39 }
 0x1c1   : > { %2733 = vmatmul.mubr.msk.f32.vlgmr.msra.gmra.mrb[4].mxu1 %vm433_vm1, %v1252_v45 }
 0x1c2   : > { %2909 = vmatpush3.bf16.msra.mxu1 %v2906_v39  ;;  %2735 = vmatprep.mubr.msk.f32.mxu1 %vm433_vm1, %v1253_v46 }
 0x1c3   : > { %2911 = vmatprep.subr.bf16.mxu1 %v2910_v44 }
 0x1c5   : > { %2736 = vmatmul.mubr.msk.f32.gmra.mrb[6].mxu1 %vm433_vm1, %v1254_v47 }
 0x1c6   : > { %2913 = vmatpush3.bf16.msra.mxu1 %v2910_v44  ;;  %2746 = vmatprep.mubr.msk.f32.mxu1 %vm433_vm1, %v1360_v48 }
 0x1c7   : > { %2970 = vmatprep.subr.bf16.mxu1 %v3533_v20 }
 0x1c9   : > { %2747 = vmatmul.mubr.msk.f32.vlgmr.msra.gmra.mrb[4].mxu1 %vm433_vm1, %v1361_v49 }
 0x1ca   : > { %2749 = vmatprep.mubr.msk.f32.mxu1 %vm433_vm1, %v1362_v50  ;;  %2972 = vmatpush3.bf16.msra.mxu1 %v3533_v20 }
 0x1cb   : > { %2971 = vmatprep.subr.bf16.mxu1 %v3551_v29 }
 0x1cd   : > { %2750 = vmatmul.mubr.msk.f32.gmra.mrb[6].mxu1 %vm433_vm1, %v1363_v51 }
 0x1ce   : > { %2973 = vmatpush3.bf16.msra.mxu1 %v3551_v29 }
 0x1ef   : > { %v518_v52 = vpop.permute.xlu1 %517  ;;  %v523_v53 = vpop.permute.xlu0 %522 }
 0x1f0   : > { %v535_v54 = vmul.f32 %v518_v52, %v3345_v27  ;;  %v536_v55 = vmul.f32 %v523_v53, %v3361_v35 }
 0x1f2   : > { %v539_v56 = vsel %vm433_vm1, %v535_v54, 0.0  ;;  %v540_v57 = vsel %vm433_vm1, %v536_v55, 0.0 }
 0x1f3   : > { %v541_v58 = vadd.f32 %v540_v57, %v539_v56  ;;  %v528_v59 = vpop.permute.xlu1 %527 }
 0x1f4   : > { %v537_v61 = vmul.f32 %v528_v59, %v3342_v26 }
 0x1f5   : > { %v542_v60 = vrot.slane %v541_v58, 4 }
 0x1f6   : > { %v548_v7 = vsel %vm433_vm1, %v537_v61, 0.0 }
 0x1f7   : > { %v543_v62 = vadd.f32 %v542_v60, %v541_v58  ;;  %v533_v63 = vpop.permute.xlu1 %532 }
 0x1f8   : > { %v538_v0 = vmul.f32 %v533_v63, %v3358_v34 }
 0x1f9   : > { %v544_v6 = vrot.slane %v543_v62, 2 }
 0x1fa   : > { %v549_v27 = vsel %vm433_vm1, %v538_v0, 0.0 }
 0x1fb   : > { %v545_v35 = vadd.f32 %v544_v6, %v543_v62  ;;  %v550_v8 = vadd.f32 %v549_v27, %v548_v7 }
 0x1fd   : > { %v546_v9 = vrot.slane %v545_v35, 1  ;;  %v551_v10 = vrot.slane %v550_v8, 4 }
 0x1ff   : > { %v547_v11 = vadd.f32 %v546_v9, %v545_v35  ;;  %v552_v12 = vadd.f32 %v551_v10, %v550_v8  ;;  %v1522_v9 = vld [vmem:[%s3727_s6 + $0x10] sm:$0xff]  ;;  %v1523_v10 = vld [vmem:[%s3727_s6 + $0x18] sm:$0xff] }
 0x201   : > { %2333 = vst.msk [vmem:[%s3509_s27] sm:$0x1] %vm2332_vm11, %v547_v11  ;;  %v553_v26 = vrot.slane %v552_v12, 2 }
 0x203   : > { %v554_v34 = vadd.f32 %v553_v26, %v552_v12  ;;  %v2926_v26 = vpack.c.bf16 %v1523_v10, %v1522_v9 }
 0x205   : > { %v555_v13 = vrot.slane %v554_v34, 1 }
 0x207   : > { %v556_v14 = vadd.f32 %v555_v13, %v554_v34  ;;  %v1730_v34 = vld [vmem:[%s3727_s6 + $0x40] sm:$0xff]  ;;  %v1731_v13 = vld [vmem:[%s3727_s6 + $0x48] sm:$0xff] }
 0x208   : > { %v2930_v17 = vpack.c.bf16 %v1731_v13, %v1730_v34 }
 0x209   : > { %2334 = vst.msk [vmem:[%s3509_s27 + $0x2] sm:$0x1] %vm2332_vm11, %v556_v14 }
 0x29c   : > { %v2748_v3 = vpop.f32.mrb[4].mxu1 }
 0x29d   : > { %v1477_v31 = vadd.f32 %v2748_v3, %v2474_v30  ;;  %v1446_v36 = vpop.f32.mrb[5].mxu1  ;;  %v1841_v3 = vld [vmem:[%s3727_s6 + $0x70] sm:$0xff] }
 0x29e   : > { %v1476_v37 = vadd.f32 %v2474_v30, %v1446_v36 }
 0x29f   : > { %v1486_v38 = vmul.f32 1.442695, %v1477_v31  ;;  %vm1481_vm12 = vcmp.gt.f32.partialorder %v1477_v31, 0.0 }
 0x2a0   : > { %v1484_v39 = vmul.f32 1.442695, %v1476_v37  ;;  %v2751_v40 = vpop.f32.mrb[6].mxu1  ;;  %vm1480_vm13 = vcmp.gt.f32.partialorder %v1476_v37, 0.0 }
 0x2a1   : > { %3087 = vpow2.f32 %v1486_v38  ;;  %v1479_v41 = vadd.f32 %v2751_v40, %v2474_v30  ;;  %v1456_v42 = vpop.f32.mrb[7].mxu1  ;;  %v1949_v40 = vld [vmem:[%s3727_s6 + $0x88] sm:$0xff] }
 0x2a2   : > { %3089 = vpow2.f32 %v1484_v39  ;;  %v1478_v43 = vadd.f32 %v2474_v30, %v1456_v42  ;;  %v1948_v39 = vld [vmem:[%s3727_s6 + $0x80] sm:$0xff] }
 0x2a3   : > { %v1490_v44 = vmul.f32 1.442695, %v1479_v41  ;;  %vm1483_vm14 = vcmp.gt.f32.partialorder %v1479_v41, 0.0  ;;  %v2946_v42 = vpack.c.bf16 %v1949_v40, %v1948_v39 }
 0x2a4   : > { %v1488_v45 = vmul.f32 1.442695, %v1478_v43  ;;  %vm1482_vm15 = vcmp.gt.f32.partialorder %v1478_v43, 0.0 }
 0x2a5   : > { %3091 = vpow2.f32 %v1490_v44  ;;  %v1950_v44 = vld [vmem:[%s3727_s6 + $0x90] sm:$0xff] }
 0x2a6   : > { %3093 = vpow2.f32 %v1488_v45  ;;  %v1951_v45 = vld [vmem:[%s3727_s6 + $0x98] sm:$0xff] }
 0x2ab   : > { %v3088_v46 = vpop.eup %3087 }
 0x2ac   : > { %v3090_v47 = vpop.eup %3089  ;;  %v2476_v48 = vadd.f32 -1.0, %v3088_v46 }
 0x2ad   : > { %v2475_v49 = vadd.f32 -1.0, %v3090_v47  ;;  %v2950_v47 = vpack.c.bf16 %v1951_v45, %v1950_v44 }
 0x2ae   : > { %v1497_v50 = vmul.f32 1.6732632, %v2476_v48 }
 0x2af   : > { %v3092_v51 = vpop.eup %3091  ;;  %v1496_v52 = vmul.f32 1.6732632, %v2475_v49  ;;  %v2057_v49 = vld [vmem:[%s3727_s6 + $0xa0] sm:$0xff] }
 0x2b0   : > { %v3094_v53 = vpop.eup %3093  ;;  %v1501_v54 = vsel %vm1481_vm12, %v1477_v31, %v1497_v50  ;;  %v2478_v55 = vadd.f32 -1.0, %v3092_v51  ;;  %v1842_v31 = vld [vmem:[%s3727_s6 + $0x78] sm:$0xff]  ;;  %v2058_v50 = vld [vmem:[%s3727_s6 + $0xa8] sm:$0xff] }
 0x2b1   : > { %v1505_v56 = vmul.f32 1.050701, %v1501_v54  ;;  %v1500_v57 = vsel %vm1480_vm13, %v1476_v37, %v1496_v52  ;;  %v2477_v58 = vadd.f32 -1.0, %v3094_v53  ;;  %v2942_v37 = vpack.c.bf16 %v1842_v31, %v1841_v3  ;;  %v2059_v54 = vld [vmem:[%s3727_s6 + $0xb0] sm:$0xff] }
 0x2b2   : > { %v1504_v59 = vmul.f32 1.050701, %v1500_v57  ;;  %v1499_v60 = vmul.f32 1.6732632, %v2478_v55  ;;  %v2954_v52 = vpack.c.bf16 %v2058_v50, %v2057_v49  ;;  %v2060_v55 = vld [vmem:[%s3727_s6 + $0xb8] sm:$0xff] }
 0x2b3   : > { %v1509_v61 = vmul.f32 %v1505_v56, %v3355_v33  ;;  %v1498_v62 = vmul.f32 1.6732632, %v2477_v58  ;;  %v2958_v57 = vpack.c.bf16 %v2060_v55, %v2059_v54 }
 0x2b4   : > { %v1508_v63 = vmul.f32 %v1504_v59, %v3336_v24  ;;  %v1503_v0 = vsel %vm1483_vm14, %v1479_v41, %v1499_v60 }
 0x2b5   : > { %1513 = vst.msk [vmem:[#allocation2 + $0xc] sm:$0xff] %vm433_vm1, %v1509_v61  ;;  %v1507_v6 = vmul.f32 1.050701, %v1503_v0  ;;  %v1502_v7 = vsel %vm1482_vm15, %v1478_v43, %v1498_v62 }
 0x2b6   : > { %1512 = vst.msk [vmem:[#allocation2 + $0x4] sm:$0xff] %vm433_vm1, %v1508_v63  ;;  %v1506_v27 = vmul.f32 1.050701, %v1502_v7 }
 0x2b7   : > { %v1511_v35 = vmul.f32 %v1507_v6, %v3353_v32 }
 0x2b8   : > { %v1510_v8 = vmul.f32 %v1506_v27, %v3334_v23 }
 0x2b9   : > { %1515 = vst.msk [vmem:[#allocation2 + $0x24] sm:$0xff] %vm433_vm1, %v1511_v35 }
 0x2ba   : > { %1514 = vst.msk [vmem:[#allocation2 + $0x1c] sm:$0xff] %vm433_vm1, %v1510_v8 }
 0x2bc   : > { %v1836_v48 = vld [vmem:[#allocation2 + $0xc] sm:$0xff] }
 0x2bd   : > { %v1524_v11 = vld [vmem:[#allocation2 + $0x2] sm:$0xff]  ;;  %v1525_v12 = vld [vmem:[#allocation2 + $0xa] sm:$0xff] }
 0x2be   : > { %2760 = vmatprep.mubr.msk.f32.mxu0 %vm433_vm1, %v1524_v11  ;;  %v1516_v5 = vld [vmem:[#allocation2 + $0x1] sm:$0xff]  ;;  %v1517_v21 = vld [vmem:[#allocation2 + $0x9] sm:$0xff] }
 0x2bf   : > { %2761 = vmatmul.mubr.msk.f32.vlgmr.msra.gmra.mrb[4].mxu0 %vm433_vm1, %v1525_v12  ;;  %v1726_v36 = vld [vmem:[#allocation2 + $0x3] sm:$0xff]  ;;  %v1727_v38 = vld [vmem:[#allocation2 + $0xb] sm:$0xff] }
 0x2c0   : > { %2925 = vmatpush3.bf16.msra.mxu0 %v3546_v28  ;;  %v2165_v18 = vld [vmem:[#allocation2 + $0x27] sm:$0xff]  ;;  %v2163_v7 = vld [vmem:[#allocation2 + $0xf] sm:$0xff] }
 0x2c1   : > { %v1526_v14 = vld [vmem:[#allocation2 + $0x1a] sm:$0xff]  ;;  %2927 = vmatprep.subr.bf16.mxu0 %v2926_v26  ;;  %v1527_v16 = vld [vmem:[#allocation2 + $0x22] sm:$0xff]  ;;  %v1945_v58 = vld [vmem:[#allocation2 + $0xd] sm:$0xff] }
 0x2c2   : > { %v2164_v15 = vld [vmem:[#allocation2 + $0x1f] sm:$0xff]  ;;  %2763 = vmatprep.mubr.msk.f32.mxu0 %vm433_vm1, %v1526_v14  ;;  %v2054_v62 = vld [vmem:[#allocation2 + $0xe] sm:$0xff] }
 0x2c3   : > { %2847 = vmatprep.mubr.msk.f32.mxu1 %vm433_vm1, %v2164_v15  ;;  %2764 = vmatmul.mubr.msk.f32.gmra.mrb[6].mxu0 %vm433_vm1, %v1527_v16  ;;  %v1518_v28 = vld [vmem:[#allocation2 + $0x19] sm:$0xff]  ;;  %v1519_v30 = vld [vmem:[#allocation2 + $0x21] sm:$0xff] }
 0x2c4   : > { %2848 = vmatmul.mubr.msk.f32.vlgmr.msra.gmra.mrb[8].mxu1 %vm433_vm1, %v2165_v18  ;;  %2929 = vmatpush3.bf16.msra.mxu0 %v2926_v26  ;;  %v1728_v41 = vld [vmem:[#allocation2 + $0x1b] sm:$0xff]  ;;  %v1729_v43 = vld [vmem:[#allocation2 + $0x23] sm:$0xff] }
 0x2c5   : > { %2774 = vmatprep.mubr.msk.f32.mxu0 %vm433_vm1, %v1516_v5  ;;  %2931 = vmatprep.subr.bf16.mxu0 %v2930_v17  ;;  %v1835_v46 = vld [vmem:[#allocation2 + $0x4] sm:$0xff]  ;;  %v1837_v51 = vld [vmem:[#allocation2 + $0x1c] sm:$0xff] }
 0x2c6   : > { %v1838_v53 = vld [vmem:[#allocation2 + $0x24] sm:$0xff] }
 0x2c7   : > { %2775 = vmatmul.mubr.msk.f32.vlgmr.msra.gmra.mrb[4].mxu0 %vm433_vm1, %v1517_v21  ;;  %v1944_v56 = vld [vmem:[#allocation2 + $0x5] sm:$0xff]  ;;  %v1946_v59 = vld [vmem:[#allocation2 + $0x1d] sm:$0xff] }
 0x2c8   : > { %2933 = vmatpush3.bf16.msra.mxu0 %v2930_v17  ;;  %2777 = vmatprep.mubr.msk.f32.mxu0 %vm433_vm1, %v1518_v28  ;;  %v1947_v60 = vld [vmem:[#allocation2 + $0x25] sm:$0xff] }
 0x2c9   : > { %2935 = vmatprep.subr.bf16.mxu0 %v2934_v4  ;;  %v2053_v61 = vld [vmem:[#allocation2 + $0x6] sm:$0xff]  ;;  %v2055_v63 = vld [vmem:[#allocation2 + $0x1e] sm:$0xff] }
 0x2ca   : > { %v2056_v0 = vld [vmem:[#allocation2 + $0x26] sm:$0xff] }
 0x2cb   : > { %2778 = vmatmul.mubr.msk.f32.gmra.mrb[6].mxu0 %vm433_vm1, %v1519_v30  ;;  %v2162_v6 = vld [vmem:[#allocation2 + $0x7] sm:$0xff] }
 0x2cc   : > { %2937 = vmatpush3.bf16.msra.mxu0 %v2934_v4  ;;  %2788 = vmatprep.mubr.msk.f32.mxu0 %vm433_vm1, %v1726_v36 }
 0x2cd   : > { %2939 = vmatprep.subr.bf16.mxu0 %v2938_v1 }
 0x2cf   : > { %2789 = vmatmul.mubr.msk.f32.vlgmr.msra.gmra.mrb[4].mxu0 %vm433_vm1, %v1727_v38 }
 0x2d0   : > { %2941 = vmatpush3.bf16.msra.mxu0 %v2938_v1  ;;  %2791 = vmatprep.mubr.msk.f32.mxu0 %vm433_vm1, %v1728_v41 }
 0x2d1   : > { %2943 = vmatprep.subr.bf16.mxu0 %v2942_v37 }
 0x2d3   : > { %2792 = vmatmul.mubr.msk.f32.gmra.mrb[6].mxu0 %vm433_vm1, %v1729_v43 }
 0x2d4   : > { %2945 = vmatpush3.bf16.msra.mxu0 %v2942_v37  ;;  %2802 = vmatprep.mubr.msk.f32.mxu0 %vm433_vm1, %v1835_v46 }
 0x2d5   : > { %2947 = vmatprep.subr.bf16.mxu0 %v2946_v42 }
 0x2d7   : > { %2803 = vmatmul.mubr.msk.f32.vlgmr.msra.gmra.mrb[4].mxu0 %vm433_vm1, %v1836_v48 }
 0x2d8   : > { %2949 = vmatpush3.bf16.msra.mxu0 %v2946_v42  ;;  %2805 = vmatprep.mubr.msk.f32.mxu0 %vm433_vm1, %v1837_v51 }
 0x2d9   : > { %2951 = vmatprep.subr.bf16.mxu0 %v2950_v47 }
 0x2db   : > { %2806 = vmatmul.mubr.msk.f32.gmra.mrb[6].mxu0 %vm433_vm1, %v1838_v53 }
 0x2dc   : > { %2953 = vmatpush3.bf16.msra.mxu0 %v2950_v47  ;;  %2816 = vmatprep.mubr.msk.f32.mxu0 %vm433_vm1, %v1944_v56 }
 0x2dd   : > { %2955 = vmatprep.subr.bf16.mxu0 %v2954_v52 }
 0x2df   : > { %2817 = vmatmul.mubr.msk.f32.vlgmr.msra.gmra.mrb[4].mxu0 %vm433_vm1, %v1945_v58 }
 0x2e0   : > { %2957 = vmatpush3.bf16.msra.mxu0 %v2954_v52  ;;  %2819 = vmatprep.mubr.msk.f32.mxu0 %vm433_vm1, %v1946_v59 }
 0x2e1   : > { %2959 = vmatprep.subr.bf16.mxu0 %v2958_v57 }
 0x2e3   : > { %2820 = vmatmul.mubr.msk.f32.gmra.mrb[6].mxu0 %vm433_vm1, %v1947_v60 }
 0x2e4   : > { %2961 = vmatpush3.bf16.msra.mxu0 %v2958_v57  ;;  %2830 = vmatprep.mubr.msk.f32.mxu0 %vm433_vm1, %v2053_v61 }
 0x2e5   : > { %2963 = vmatprep.subr.bf16.mxu0 %v3533_v20 }
 0x2e7   : > { %2831 = vmatmul.mubr.msk.f32.vlgmr.msra.gmra.mrb[4].mxu0 %vm433_vm1, %v2054_v62 }
 0x2e8   : > { %2965 = vmatpush3.bf16.msra.mxu0 %v3533_v20  ;;  %2833 = vmatprep.mubr.msk.f32.mxu0 %vm433_vm1, %v2055_v63  ;;  %v2507_v20 = vld [vmem:[%s3728_s7] ss:$0 sm:$0xff] }
 0x2e9   : > { %2967 = vmatprep.subr.bf16.mxu0 %v3551_v29 }
 0x2eb   : > { %2834 = vmatmul.mubr.msk.f32.gmra.mrb[6].mxu0 %vm433_vm1, %v2056_v0 }
 0x2ec   : > { %2969 = vmatpush3.bf16.msra.mxu0 %v3551_v29  ;;  %2844 = vmatprep.mubr.msk.f32.mxu0 %vm433_vm1, %v2162_v6 }
 0x2ef   : > { %2845 = vmatmul.mubr.msk.f32.vlgmr.msra.gmra.mrb[4].mxu0 %vm433_vm1, %v2163_v7 }
 0x397   : > { %v2849_v27 = vpop.f32.mrb[8].mxu1 }
 0x398   : > { %v2258_v35 = vpop.f32.mrb[9].mxu1 }
 0x3be   : > { %v2835_v8 = vpop.f32.mrb[6].mxu0 }
 0x3bf   : > { %v2978_v9 = vadd.f32 %v2849_v27, %v2835_v8  ;;  %v2149_v10 = vpop.f32.mrb[7].mxu0 }
 0x3c0   : > { %v2979_v11 = vadd.f32 %v2258_v35, %v2149_v10 }
 0x3c1   : > { %v2281_v12 = vadd.f32 %v2978_v9, %v2507_v20 }
 0x3c2   : > { %v2280_v26 = vadd.f32 %v2979_v11, %v2507_v20  ;;  %v2846_v34 = vpop.f32.mrb[4].mxu0 }
 0x3c3   : > { %v2292_v13 = vmul.f32 1.442695, %v2281_v12  ;;  %v2279_v29 = vadd.f32 %v2846_v34, %v2507_v20  ;;  %v2248_v14 = vpop.f32.mrb[5].mxu0  ;;  %vm2285_vm0 = vcmp.gt.f32.partialorder %v2281_v12, 0.0 }
 0x3c4   : > { %v2290_v15 = vmul.f32 1.442695, %v2280_v26  ;;  %v2278_v16 = vadd.f32 %v2507_v20, %v2248_v14  ;;  %vm2284_vm2 = vcmp.gt.f32.partialorder %v2280_v26, 0.0 }
 0x3c5   : > { %3095 = vpow2.f32 %v2292_v13  ;;  %v2288_v17 = vmul.f32 1.442695, %v2279_v29  ;;  %vm2283_vm3 = vcmp.gt.f32.partialorder %v2279_v29, 0.0 }
 0x3c6   : > { %3097 = vpow2.f32 %v2290_v15  ;;  %v2286_v18 = vmul.f32 1.442695, %v2278_v16  ;;  %vm2282_vm4 = vcmp.gt.f32.partialorder %v2278_v16, 0.0 }
 0x3c7   : > { %3099 = vpow2.f32 %v2288_v17 }
 0x3c8   : > { %3101 = vpow2.f32 %v2286_v18 }
 0x3cf   : > { %v3096_v2 = vpop.eup %3095 }
 0x3d0   : > { %v3098_v19 = vpop.eup %3097  ;;  %v2511_v5 = vadd.f32 -1.0, %v3096_v2 }
 0x3d1   : > { %v3100_v4 = vpop.eup %3099  ;;  %v2510_v21 = vadd.f32 -1.0, %v3098_v19 }
 0x3d2   : > { %v3102_v22 = vpop.eup %3101  ;;  %v2301_v25 = vmul.f32 1.6732632, %v2511_v5  ;;  %v2509_v28 = vadd.f32 -1.0, %v3100_v4 }
 0x3d3   : > { %v2300_v1 = vmul.f32 1.6732632, %v2510_v21  ;;  %v2508_v30 = vadd.f32 -1.0, %v3102_v22 }
 0x3d4   : > { %v2305_v3 = vsel %vm2285_vm0, %v2281_v12, %v2301_v25  ;;  %v2299_v31 = vmul.f32 1.6732632, %v2509_v28 }
 0x3d5   : > { %v2309_v36 = vmul.f32 1.050701, %v2305_v3  ;;  %v2304_v37 = vsel %vm2284_vm2, %v2280_v26, %v2300_v1  ;;  %v2298_v38 = vmul.f32 1.6732632, %v2508_v30 }
 0x3d6   : > { %v2308_v39 = vmul.f32 1.050701, %v2304_v37  ;;  %v2303_v40 = vsel %vm2283_vm3, %v2279_v29, %v2299_v31 }
 0x3d7   : > { %v2313_v41 = vmul.f32 %v2309_v36, %v3353_v32  ;;  %v2307_v42 = vmul.f32 1.050701, %v2303_v40  ;;  %v2302_v43 = vsel %vm2282_vm4, %v2278_v16, %v2298_v38 }
 0x3d8   : > { %v2312_v44 = vmul.f32 %v2308_v39, %v3334_v23  ;;  %v2306_v45 = vmul.f32 1.050701, %v2302_v43 }
 0x3d9   : > { %v2324_v46 = vsel %vm433_vm1, %v2313_v41, -inf  ;;  %v2311_v47 = vmul.f32 %v2307_v42, %v3355_v33 }
 0x3da   : > { %v2323_v48 = vsel %vm433_vm1, %v2312_v44, -inf  ;;  %v2310_v49 = vmul.f32 %v2306_v45, %v3336_v24 }
 0x3db   : > { %v2325_v50 = vmax.f32 %v2323_v48, %v2324_v46  ;;  %v2315_v51 = vsel %vm433_vm1, %v2311_v47, -inf }
 0x3dc   : > { %v2314_v32 = vsel %vm433_vm1, %v2310_v49, -inf }
 0x3dd   : > { %v2326_v52 = vrot.slane %v2325_v50, 4  ;;  %v2316_v53 = vmax.f32 %v2314_v32, %v2315_v51 }
 0x3df   : > { %v2327_v23 = vmax.f32 %v2325_v50, %v2326_v52  ;;  %v2317_v54 = vrot.slane %v2316_v53, 4 }
 0x3e1   : > { %v2328_v55 = vrot.slane %v2327_v23, 2  ;;  %v2318_v33 = vmax.f32 %v2316_v53, %v2317_v54 }
 0x3e3   : > { %v2329_v56 = vmax.f32 %v2327_v23, %v2328_v55  ;;  %v2319_v57 = vrot.slane %v2318_v33, 2 }
 0x3e5   : > { %v2330_v58 = vrot.slane %v2329_v56, 1  ;;  %v2320_v59 = vmax.f32 %v2318_v33, %v2319_v57 }
 0x3e7   : > { %v2331_v24 = vmax.f32 %v2329_v56, %v2330_v58  ;;  %v2321_v60 = vrot.slane %v2320_v59, 1 }
 0x3e9   : > { %2336 = vst.msk [vmem:[%s3509_s27 + $0x3] sm:$0x1] %vm2332_vm11, %v2331_v24  ;;  %v2322_v61 = vmax.f32 %v2320_v59, %v2321_v60 }
 0x3eb   : > { %2335 = vst.msk [vmem:[%s3509_s27 + $0x1] sm:$0x1] %vm2332_vm11, %v2322_v61 }
 0x3ec   : > { %3116 = shalt.err (!%p3113_p3)
}
 0x3ed   : > { %s3117_s19 = scalar_lea.hbm %s3670_s30, 64  ;;  %s3121_s21 = scalar_lea.hbm %s3731_s10, 192 }
 0x3ee   : > { %p3118_p4 = scmp.ne.s32.totalorder %s3670_s30, %s3117_s19  ;;  %p3122_p9 = scmp.lt.u32.totalorder %s3670_s30, %s3731_s10 }
 0x3ef   : > { %p3123_p10 = scmp.lt.u32.totalorder %s3121_s21, %s3117_s19  ;;  %p3125_p12 = scmp.lt.u32.totalorder %s3117_s19, %s3670_s30 }
 0x3f0   : > { %p3119_p7 = pnand %p3118_p4, %p3268_p5 }
 0x3f1   : > { %p3124_p11 = por %p3123_p10, %p3122_p9 }
 0x3f2   : > { %p3120_p8 = pneg %p3119_p7 }
 0x3f3   : > { %p3126_p13 = por %p3125_p12, %p3124_p11 }
 0x3f5   : > { %p3127_p0 = pnand %p3126_p13, %p3120_p8 }
 0x3f7   : > { %3130 = shalt.err (!%p3127_p0)
}
 0x3f8   : > { %s3170_s11 = smov 32   ;;  %s3171_s12 = smov 2  }
 0x3f9   : > { %3022 = dma.vmem_to_hbm [thread:$0]  (%p3268_p5), %s3672_s22, 64, %s3670_s30, %s3680_s9, %s3170_s11, %s3170_s11, %s3171_s12  }
 0x3fa PF: > { %p3028_p1 = scmp.ge.s32.totalorder %s3165_s18, 2  ;;  %s2366_s13 = sand.u32 1, %s3153_s15  }
 0x3fb   : > { %s2367_s14 = scalar_lea.sflag [#allocation5], %s2366_s13 }
 0x3fc   : > { %p3025_p2 = pnand %p3028_p1, %p3272_p6 }
 0x3fe   : > { %3148 = dma.done.wait (!%p3025_p2), %s2367_s14, 64  }
 0x3ff   : > { %3150 = vsyncadd (!%p3025_p2), %s2367_s14, 4294967232  ;;  %p21_p3 = scmp.ge.s32.totalorder %s3255_s20, 5   ;;  %s3734_s15 = smov %s3157_s16 }
 0x400   : > { %s3735_s16 = smov %s3161_s17  ;;  %s3736_s17 = smov %s3266_s23 }
 0x401   : > { %s3737_s18 = smov %s3255_s20  ;;  %23 = sbr.rel (!%p21_p3) target bundleno = 5 (0x5), region = 98 }
 0x408   :  { %2372 = vsyncpa [#allocation5], 1 }
 0x409   :  { %2374 = vsyncpa [#allocation5 + $0x1], 1 }

</bundles_post_ra>
